<compile_context>
chip_gen: v6e
topology: v6e:2x2x1
jax: 0.10.0
libtpu: 0.0.40
codegen_flags: <defaults>
</compile_context>

<pallas_src>
import functools
import math

import jax
import jax.numpy as jnp
from jax.experimental import pallas as pl
from jax.experimental.pallas import tpu as pltpu


# -----------------------------------------------------------------------------
# Fused forward kernel: one grid step = (one batch tile, one encoder layer)
# -----------------------------------------------------------------------------
def _fused_forward_kernel(
    src_ref,                       # (S, BT, input_dim)
    w_in_ref, b_in_ref,            # (input_dim, D), (1, D)
    wq_ref, bq_ref,                # (D, D), (1, D)      -- this layer
    wk_ref, bk_ref,
    wv_ref, bv_ref,
    att_w_ref, att_b_ref,          # (D, D), (1, D)
    ff1_w_ref, ff1_b_ref,          # (D, F), (1, F)
    ff2_w_ref, ff2_b_ref,          # (F, D), (1, D)
    n1_g_ref, n1_b_ref,            # (1, D)
    n2_g_ref, n2_b_ref,            # (1, D)
    dec_w_ref, dec_b_ref,          # (D, input_dim), (1, input_dim)
    out_ref,                       # (S, BT, input_dim)
    x_ref,                         # VMEM scratch (BT*S, D) f32 -- residual stream
    *, nhead, batch_tile, eps=1e-5):
    layer = pl.program_id(1)
    num_layers = pl.num_programs(1)
    BT = batch_tile
    R, D = x_ref.shape             # R = BT * S rows, batch-major
    S = R // BT
    hd = D // nhead
    scale = 1.0 / math.sqrt(hd)
    wdtype = wq_ref.dtype          # f32 or bf16 layer weights

    # ---- input projection, once per batch tile (first layer step) ----------
    @pl.when(layer == 0)
    def _():
        src_blk = src_ref[...]                                # (S, BT, in)
        for b in range(BT):                                   # static unroll
            rows = (jnp.dot(src_blk[:, b, :], w_in_ref[...],
                            preferred_element_type=jnp.float32)
                    + b_in_ref[...])                          # (S, D)
            x_ref[b * S:(b + 1) * S, :] = rows                # batch-major rows

    x = x_ref[...]                                            # (R, D) f32

    def layer_norm(y, g, b):                                  # all f32 (v5e VPU)
        mu = jnp.mean(y, axis=-1, keepdims=True)
        var = jnp.mean(jnp.square(y - mu), axis=-1, keepdims=True)
        return (y - mu) * jax.lax.rsqrt(var + eps) * g + b

    # ---- multi-head self attention (whole batch tile, VMEM-resident) -------
    xm = x.astype(wdtype)
    q = jnp.dot(xm, wq_ref[...], preferred_element_type=jnp.float32) + bq_ref[...]
    k = jnp.dot(xm, wk_ref[...], preferred_element_type=jnp.float32) + bk_ref[...]
    v = jnp.dot(xm, wv_ref[...], preferred_element_type=jnp.float32) + bv_ref[...]
    att_w = att_w_ref[...]

    attn_blocks = []
    for b in range(BT):                                       # static unroll
        r0 = b * S
        acc_b = jnp.zeros((S, D), jnp.float32)
        for h in range(nhead):                                # static unroll
            c0 = h * hd
            qh = q[r0:r0 + S, c0:c0 + hd]                     # (S, hd)
            kh = k[r0:r0 + S, c0:c0 + hd]
            vh = v[r0:r0 + S, c0:c0 + hd]
            s = jax.lax.dot_general(qh, kh, (((1,), (1,)), ((), ())),
                                    preferred_element_type=jnp.float32) * scale
            s = s - jnp.max(s, axis=-1, keepdims=True)
            p = jnp.exp(s)
            p = p / jnp.sum(p, axis=-1, keepdims=True)        # exact softmax
            ho = jnp.dot(p, vh, preferred_element_type=jnp.float32)   # (S, hd)
            # Fuse the head concat into the output projection: sublane-aligned
            # row slice of att_w, accumulated in f32.
            acc_b = acc_b + jnp.dot(ho.astype(wdtype), att_w[c0:c0 + hd, :],
                                    preferred_element_type=jnp.float32)
        attn_blocks.append(acc_b)
    attn = attn_blocks[0] if BT == 1 else jnp.concatenate(attn_blocks, axis=0)
    attn = attn + att_b_ref[...]                              # (R, D)

    x = layer_norm(x + attn, n1_g_ref[...], n1_b_ref[...])    # post-norm

    # ---- feed forward -------------------------------------------------------
    f = (jnp.dot(x.astype(wdtype), ff1_w_ref[...],
                 preferred_element_type=jnp.float32) + ff1_b_ref[...])
    f = jnp.maximum(f, 0.0)
    f = (jnp.dot(f.astype(wdtype), ff2_w_ref[...],
                 preferred_element_type=jnp.float32) + ff2_b_ref[...])
    x = layer_norm(x + f, n2_g_ref[...], n2_b_ref[...])
    x_ref[...] = x                                            # carry to next layer

    # ---- decoder projection after the last layer ----------------------------
    @pl.when(layer == num_layers - 1)
    def _():
        dec = (jnp.dot(x, dec_w_ref[...], preferred_element_type=jnp.float32)
               + dec_b_ref[...])                              # (R, input_dim)
        for b in range(BT):                                   # static unroll
            out_ref[:, b:b + 1, :] = (
                dec[b * S:(b + 1) * S, :].astype(out_ref.dtype)[:, None, :])


# -----------------------------------------------------------------------------
# Wrapper: one fused pallas_call, no activation transposes outside the kernel
# -----------------------------------------------------------------------------
def transformer_forward(src, params, nhead, batch_tile=None):
    # src: (S, B, input_dim)  -- PyTorch batch_first=False convention
    S, B, input_dim = src.shape
    D = params["w_in"].shape[1]
    L = params["wq"].shape[0]
    BT = B if batch_tile is None else batch_tile
    assert B % BT == 0, "batch_tile must divide batch"
    NB = B // BT

    def const2d(arr):            # full 2-D array, same block every step
        return pl.BlockSpec(arr.shape, lambda nb, l: (0, 0))

    def per_layer(arr):          # stacked (L, r, c) -> per-layer (r, c)
        return pl.BlockSpec((None,) + arr.shape[1:], lambda nb, l: (l, 0, 0))

    io_spec = pl.BlockSpec((S, BT, input_dim), lambda nb, l: (0, nb, 0))

    kern = functools.partial(_fused_forward_kernel, nhead=nhead, batch_tile=BT)

    out = pl.pallas_call(
        kern,
        out_shape=jax.ShapeDtypeStruct((S, B, input_dim), src.dtype),
        grid=(NB, L),
        in_specs=[
            io_spec,
            const2d(params["w_in"]), const2d(params["b_in"]),
            per_layer(params["wq"]), per_layer(params["bq"]),
            per_layer(params["wk"]), per_layer(params["bk"]),
            per_layer(params["wv"]), per_layer(params["bv"]),
            per_layer(params["att_w"]), per_layer(params["att_b"]),
            per_layer(params["ff1_w"]), per_layer(params["ff1_b"]),
            per_layer(params["ff2_w"]), per_layer(params["ff2_b"]),
            per_layer(params["n1_g"]), per_layer(params["n1_b"]),
            per_layer(params["n2_g"]), per_layer(params["n2_b"]),
            const2d(params["w_dec"]), const2d(params["b_dec"]),
        ],
        out_specs=io_spec,
        scratch_shapes=[pltpu.VMEM((BT * S, D), jnp.float32)],
        compiler_params=pltpu.CompilerParams(
            # Batch-tile axis parallel (v7x 2-core sharding), layer axis MUST
            # stay minor + arbitrary for the residual-stream carry.
            dimension_semantics=("parallel", "arbitrary"),
            vmem_limit_bytes=32 * 1024 * 1024,  # re-budget (bf16 / k-loop) on v7x at large d_model
        ),
    )(src,
      params["w_in"], params["b_in"],
      params["wq"], params["bq"],
      params["wk"], params["bk"],
      params["wv"], params["bv"],
      params["att_w"], params["att_b"],
      params["ff1_w"], params["ff1_b"],
      params["ff2_w"], params["ff2_b"],
      params["n1_g"], params["n1_b"],
      params["n2_g"], params["n2_b"],
      params["w_dec"], params["b_dec"])
    return out                                                # (S, B, input_dim)


# -----------------------------------------------------------------------------
# Parameters: weights stored (in, out); per-layer weights stacked on axis 0
# -----------------------------------------------------------------------------
def init_params(key, input_dim, d_model, nhead, num_layers, dim_feedforward):
    ks = jax.random.split(key, 16)
    L = num_layers

    def rnd(k, *shape):
        return jax.random.normal(k, shape, jnp.float32) * 0.02

    return {
        "w_in": rnd(ks[0], input_dim, d_model), "b_in": rnd(ks[1], 1, d_model),
        "w_dec": rnd(ks[2], d_model, input_dim), "b_dec": rnd(ks[3], 1, input_dim),
        "wq": rnd(ks[4], L, d_model, d_model), "bq": rnd(ks[5], L, 1, d_model),
        "wk": rnd(ks[6], L, d_model, d_model), "bk": rnd(ks[7], L, 1, d_model),
        "wv": rnd(ks[8], L, d_model, d_model), "bv": rnd(ks[9], L, 1, d_model),
        "att_w": rnd(ks[10], L, d_model, d_model), "att_b": rnd(ks[11], L, 1, d_model),
        "ff1_w": rnd(ks[12], L, d_model, dim_feedforward),
        "ff1_b": rnd(ks[13], L, 1, dim_feedforward),
        "ff2_w": rnd(ks[14], L, dim_feedforward, d_model),
        "ff2_b": rnd(ks[15], L, 1, d_model),
        "n1_g": jnp.ones((L, 1, d_model), jnp.float32),
        "n1_b": jnp.zeros((L, 1, d_model), jnp.float32),
        "n2_g": jnp.ones((L, 1, d_model), jnp.float32),
        "n2_b": jnp.zeros((L, 1, d_model), jnp.float32),
    }


def cast_layer_weights(params, dtype):
    # bf16 per-layer weight matrices (v6e/v7x): halves weight DMA, 2x MXU rate.
    p = dict(params)
    for k in ("wq", "wk", "wv", "att_w", "ff1_w", "ff2_w"):
        p[k] = params[k].astype(dtype)
    return p


# -----------------------------------------------------------------------------
# Pure-JAX reference (same math, incl. weight-dtype casts) for the sanity check
# -----------------------------------------------------------------------------
def reference_forward(src, params, nhead):
    S, B, _ = src.shape
    D = params["w_in"].shape[1]
    hd = D // nhead

    def mm(a, w):
        return jnp.dot(a.astype(w.dtype), w, preferred_element_type=jnp.float32)

    def ln(y, g, b):
        m = jnp.mean(y, -1, keepdims=True)
        v = jnp.mean((y - m) ** 2, -1, keepdims=True)
        return (y - m) * jax.lax.rsqrt(v + 1e-5) * g + b

    x = mm(src, params["w_in"]) + params["b_in"]
    for l in range(params["wq"].shape[0]):
        q = mm(x, params["wq"][l]) + params["bq"][l]
        k = mm(x, params["wk"][l]) + params["bk"][l]
        v = mm(x, params["wv"][l]) + params["bv"][l]
        heads = lambda t: t.reshape(S, B, nhead, hd).transpose(1, 2, 0, 3)
        qh, kh, vh = heads(q), heads(k), heads(v)
        s = jnp.einsum("bhsd,bhtd->bhst", qh, kh,
                       preferred_element_type=jnp.float32) / math.sqrt(hd)
        p = jax.nn.softmax(s, axis=-1)
        a = jnp.einsum("bhst,bhtd->bhsd", p, vh,
                       preferred_element_type=jnp.float32)
        a = a.transpose(2, 0, 1, 3).reshape(S, B, D)
        attn = mm(a, params["att_w"][l]) + params["att_b"][l]
        x = ln(x + attn, params["n1_g"][l], params["n1_b"][l])
        f = jnp.maximum(mm(x, params["ff1_w"][l]) + params["ff1_b"][l], 0.0)
        f = mm(f, params["ff2_w"][l]) + params["ff2_b"][l]
        x = ln(x + f, params["n2_g"][l], params["n2_b"][l])
    return mm(x, params["w_dec"]) + params["b_dec"]


# -----------------------------------------------------------------------------
if __name__ == "__main__":
    # Small shapes consistent with the module: seq=8, batch=2, input_dim=8
    S, B, INPUT_DIM = 8, 2, 8
    D_MODEL, NHEAD, NUM_LAYERS, DIM_FF = 64, 4, 2, 128

    key = jax.random.PRNGKey(0)
    k_params, k_src = jax.random.split(key)
    params = init_params(k_params, INPUT_DIM, D_MODEL, NHEAD, NUM_LAYERS, DIM_FF)
    src = jax.random.normal(k_src, (S, B, INPUT_DIM), jnp.float32)

    fwd = jax.jit(functools.partial(transformer_forward, nhead=NHEAD))

    # f32 weights: tight check against the pure-JAX reference.
    out = jax.block_until_ready(fwd(src, params))
    ref = jax.block_until_ready(reference_forward(src, params, NHEAD))
    assert out.shape == (S, B, INPUT_DIM), out.shape
    assert jnp.allclose(out, ref, atol=2e-3, rtol=2e-3), "f32 mismatch vs reference"

    # bf16 per-layer weights (v6e/v7x DMA/MXU optimization): check against a
    # reference that applies the same weight-dtype casts.
    params_bf16 = cast_layer_weights(params, jnp.bfloat16)
    out_bf = jax.block_until_ready(fwd(src, params_bf16))
    ref_bf = jax.block_until_ready(reference_forward(src, params_bf16, NHEAD))
    assert jnp.allclose(out_bf, ref_bf, atol=5e-3, rtol=5e-3), "bf16 mismatch vs reference"

    print("KERNEL_OK")
</pallas_src>

<mosaic_0001>
module attributes {stable_mosaic.version = 11 : i64} {
  func.func @_fused_forward_kernel(%arg0: i32, %arg1: i32, %arg2: memref<8x2x8xf32, #tpu.memory_space<vmem>>, %arg3: memref<8x64xf32, #tpu.memory_space<vmem>>, %arg4: memref<1x64xf32, #tpu.memory_space<vmem>>, %arg5: memref<1x64x64xf32, #tpu.memory_space<vmem>>, %arg6: memref<1x1x64xf32, #tpu.memory_space<vmem>>, %arg7: memref<1x64x64xf32, #tpu.memory_space<vmem>>, %arg8: memref<1x1x64xf32, #tpu.memory_space<vmem>>, %arg9: memref<1x64x64xf32, #tpu.memory_space<vmem>>, %arg10: memref<1x1x64xf32, #tpu.memory_space<vmem>>, %arg11: memref<1x64x64xf32, #tpu.memory_space<vmem>>, %arg12: memref<1x1x64xf32, #tpu.memory_space<vmem>>, %arg13: memref<1x64x128xf32, #tpu.memory_space<vmem>>, %arg14: memref<1x1x128xf32, #tpu.memory_space<vmem>>, %arg15: memref<1x128x64xf32, #tpu.memory_space<vmem>>, %arg16: memref<1x1x64xf32, #tpu.memory_space<vmem>>, %arg17: memref<1x1x64xf32, #tpu.memory_space<vmem>>, %arg18: memref<1x1x64xf32, #tpu.memory_space<vmem>>, %arg19: memref<1x1x64xf32, #tpu.memory_space<vmem>>, %arg20: memref<1x1x64xf32, #tpu.memory_space<vmem>>, %arg21: memref<64x8xf32, #tpu.memory_space<vmem>>, %arg22: memref<1x8xf32, #tpu.memory_space<vmem>>, %arg23: memref<8x2x8xf32, #tpu.memory_space<vmem>>, %arg24: memref<16x64xf32, #tpu.memory_space<vmem>>) attributes {dimension_semantics = [#tpu.dimension_semantics<parallel>, #tpu.dimension_semantics<arbitrary>], iteration_bounds = array<i64: 1, 2>, scalar_prefetch = 0 : i64, scratch_operands = 1 : i64, tpu.core_type = #tpu.core_type<tc>, window_params = [{transform_indices = @transform_0, window_bounds = array<i64: 8, 2, 8>}, {pipeline_mode = #tpu.pipeline_mode<synchronous>, transform_indices = @transform_1, window_bounds = array<i64: 8, 64>}, {pipeline_mode = #tpu.pipeline_mode<synchronous>, transform_indices = @transform_2, window_bounds = array<i64: 1, 64>}, {transform_indices = @transform_3, window_bounds = array<i64: 1, 64, 64>}, {transform_indices = @transform_4, window_bounds = array<i64: 1, 1, 64>}, {transform_indices = @transform_5, window_bounds = array<i64: 1, 64, 64>}, {transform_indices = @transform_6, window_bounds = array<i64: 1, 1, 64>}, {transform_indices = @transform_7, window_bounds = array<i64: 1, 64, 64>}, {transform_indices = @transform_8, window_bounds = array<i64: 1, 1, 64>}, {transform_indices = @transform_9, window_bounds = array<i64: 1, 64, 64>}, {transform_indices = @transform_10, window_bounds = array<i64: 1, 1, 64>}, {transform_indices = @transform_11, window_bounds = array<i64: 1, 64, 128>}, {transform_indices = @transform_12, window_bounds = array<i64: 1, 1, 128>}, {transform_indices = @transform_13, window_bounds = array<i64: 1, 128, 64>}, {transform_indices = @transform_14, window_bounds = array<i64: 1, 1, 64>}, {transform_indices = @transform_15, window_bounds = array<i64: 1, 1, 64>}, {transform_indices = @transform_16, window_bounds = array<i64: 1, 1, 64>}, {transform_indices = @transform_17, window_bounds = array<i64: 1, 1, 64>}, {transform_indices = @transform_18, window_bounds = array<i64: 1, 1, 64>}, {pipeline_mode = #tpu.pipeline_mode<synchronous>, transform_indices = @transform_19, window_bounds = array<i64: 64, 8>}, {pipeline_mode = #tpu.pipeline_mode<synchronous>, transform_indices = @transform_20, window_bounds = array<i64: 1, 8>}, {transform_indices = @transform_21, window_bounds = array<i64: 8, 2, 8>}]} {
    %c0_i32 = arith.constant 0 : i32
    %0 = arith.cmpi eq, %arg1, %c0_i32 : i32
    %1 = arith.extui %0 : i1 to i32
    %c0_i32_0 = arith.constant 0 : i32
    %2 = arith.cmpi ne, %1, %c0_i32_0 : i32
    scf.if %2 {
      %c0_118 = arith.constant 0 : index
      %c0_119 = arith.constant 0 : index
      %c0_120 = arith.constant 0 : index
      %260 = vector.load %arg2[%c0_118, %c0_119, %c0_120] : memref<8x2x8xf32, #tpu.memory_space<vmem>>, vector<8x2x8xf32>
      %261 = vector.extract_strided_slice %260 {offsets = [0, 0, 0], sizes = [8, 1, 8], strides = [1, 1, 1]} : vector<8x2x8xf32> to vector<8x1x8xf32>
      %262 = vector.shape_cast %261 : vector<8x1x8xf32> to vector<8x8xf32>
      %c0_121 = arith.constant 0 : index
      %c0_122 = arith.constant 0 : index
      %263 = vector.load %arg3[%c0_121, %c0_122] : memref<8x64xf32, #tpu.memory_space<vmem>>, vector<8x64xf32>
      %cst_123 = arith.constant dense<0.000000e+00> : vector<8x64xf32>
      %264 = tpu.matmul %262, %263, %cst_123 {dimension_numbers = #tpu.dot_dimension_numbers<[1], [0], [0], [1], [0, 0, 1, 1], [], []>} : vector<8x8xf32>, vector<8x64xf32>, vector<8x64xf32> -> vector<8x64xf32>
      %c0_124 = arith.constant 0 : index
      %c0_125 = arith.constant 0 : index
      %265 = vector.load %arg4[%c0_124, %c0_125] : memref<1x64xf32, #tpu.memory_space<vmem>>, vector<1x64xf32>
      %266 = vector.broadcast %265 : vector<1x64xf32> to vector<8x64xf32>
      %267 = arith.addf %264, %266 : vector<8x64xf32>
      %c0_126 = arith.constant 0 : index
      %c0_127 = arith.constant 0 : index
      %268 = vector.load %arg24[%c0_126, %c0_127] : memref<16x64xf32, #tpu.memory_space<vmem>>, vector<8x64xf32>
      tpu.vector_store %arg24[%c0_126, %c0_127], %267 {strides = array<i32>} : memref<16x64xf32, #tpu.memory_space<vmem>>, vector<8x64xf32>,
      %269 = vector.extract_strided_slice %260 {offsets = [0, 1, 0], sizes = [8, 1, 8], strides = [1, 1, 1]} : vector<8x2x8xf32> to vector<8x1x8xf32>
      %270 = vector.shape_cast %269 : vector<8x1x8xf32> to vector<8x8xf32>
      %c0_128 = arith.constant 0 : index
      %c0_129 = arith.constant 0 : index
      %271 = vector.load %arg3[%c0_128, %c0_129] : memref<8x64xf32, #tpu.memory_space<vmem>>, vector<8x64xf32>
      %cst_130 = arith.constant dense<0.000000e+00> : vector<8x64xf32>
      %272 = tpu.matmul %270, %271, %cst_130 {dimension_numbers = #tpu.dot_dimension_numbers<[1], [0], [0], [1], [0, 0, 1, 1], [], []>} : vector<8x8xf32>, vector<8x64xf32>, vector<8x64xf32> -> vector<8x64xf32>
      %c0_131 = arith.constant 0 : index
      %c0_132 = arith.constant 0 : index
      %273 = vector.load %arg4[%c0_131, %c0_132] : memref<1x64xf32, #tpu.memory_space<vmem>>, vector<1x64xf32>
      %274 = vector.broadcast %273 : vector<1x64xf32> to vector<8x64xf32>
      %275 = arith.addf %272, %274 : vector<8x64xf32>
      %c8 = arith.constant 8 : index
      %c0_133 = arith.constant 0 : index
      %276 = vector.load %arg24[%c8, %c0_133] : memref<16x64xf32, #tpu.memory_space<vmem>>, vector<8x64xf32>
      tpu.vector_store %arg24[%c8, %c0_133], %275 {strides = array<i32>} : memref<16x64xf32, #tpu.memory_space<vmem>>, vector<8x64xf32>,
    } else {
    }
    %c0 = arith.constant 0 : index
    %c0_1 = arith.constant 0 : index
    %3 = vector.load %arg24[%c0, %c0_1] : memref<16x64xf32, #tpu.memory_space<vmem>>, vector<16x64xf32>
    %c0_2 = arith.constant 0 : index
    %c0_3 = arith.constant 0 : index
    %c0_4 = arith.constant 0 : index
    %4 = vector.load %arg5[%c0_2, %c0_3, %c0_4] : memref<1x64x64xf32, #tpu.memory_space<vmem>>, vector<1x64x64xf32>
    %5 = vector.shape_cast %4 : vector<1x64x64xf32> to vector<64x64xf32>
    %cst = arith.constant dense<0.000000e+00> : vector<16x64xf32>
    %6 = tpu.matmul %3, %5, %cst {dimension_numbers = #tpu.dot_dimension_numbers<[1], [0], [0], [1], [0, 0, 1, 1], [], []>} : vector<16x64xf32>, vector<64x64xf32>, vector<16x64xf32> -> vector<16x64xf32>
    %c0_5 = arith.constant 0 : index
    %c0_6 = arith.constant 0 : index
    %c0_7 = arith.constant 0 : index
    %7 = vector.load %arg6[%c0_5, %c0_6, %c0_7] : memref<1x1x64xf32, #tpu.memory_space<vmem>>, vector<1x1x64xf32>
    %8 = vector.shape_cast %7 : vector<1x1x64xf32> to vector<1x64xf32>
    %9 = vector.broadcast %8 : vector<1x64xf32> to vector<16x64xf32>
    %10 = arith.addf %6, %9 : vector<16x64xf32>
    %c0_8 = arith.constant 0 : index
    %c0_9 = arith.constant 0 : index
    %c0_10 = arith.constant 0 : index
    %11 = vector.load %arg7[%c0_8, %c0_9, %c0_10] : memref<1x64x64xf32, #tpu.memory_space<vmem>>, vector<1x64x64xf32>
    %12 = vector.shape_cast %11 : vector<1x64x64xf32> to vector<64x64xf32>
    %cst_11 = arith.constant dense<0.000000e+00> : vector<16x64xf32>
    %13 = tpu.matmul %3, %12, %cst_11 {dimension_numbers = #tpu.dot_dimension_numbers<[1], [0], [0], [1], [0, 0, 1, 1], [], []>} : vector<16x64xf32>, vector<64x64xf32>, vector<16x64xf32> -> vector<16x64xf32>
    %c0_12 = arith.constant 0 : index
    %c0_13 = arith.constant 0 : index
    %c0_14 = arith.constant 0 : index
    %14 = vector.load %arg8[%c0_12, %c0_13, %c0_14] : memref<1x1x64xf32, #tpu.memory_space<vmem>>, vector<1x1x64xf32>
    %15 = vector.shape_cast %14 : vector<1x1x64xf32> to vector<1x64xf32>
    %16 = vector.broadcast %15 : vector<1x64xf32> to vector<16x64xf32>
    %17 = arith.addf %13, %16 : vector<16x64xf32>
    %c0_15 = arith.constant 0 : index
    %c0_16 = arith.constant 0 : index
    %c0_17 = arith.constant 0 : index
    %18 = vector.load %arg9[%c0_15, %c0_16, %c0_17] : memref<1x64x64xf32, #tpu.memory_space<vmem>>, vector<1x64x64xf32>
    %19 = vector.shape_cast %18 : vector<1x64x64xf32> to vector<64x64xf32>
    %cst_18 = arith.constant dense<0.000000e+00> : vector<16x64xf32>
    %20 = tpu.matmul %3, %19, %cst_18 {dimension_numbers = #tpu.dot_dimension_numbers<[1], [0], [0], [1], [0, 0, 1, 1], [], []>} : vector<16x64xf32>, vector<64x64xf32>, vector<16x64xf32> -> vector<16x64xf32>
    %c0_19 = arith.constant 0 : index
    %c0_20 = arith.constant 0 : index
    %c0_21 = arith.constant 0 : index
    %21 = vector.load %arg10[%c0_19, %c0_20, %c0_21] : memref<1x1x64xf32, #tpu.memory_space<vmem>>, vector<1x1x64xf32>
    %22 = vector.shape_cast %21 : vector<1x1x64xf32> to vector<1x64xf32>
    %23 = vector.broadcast %22 : vector<1x64xf32> to vector<16x64xf32>
    %24 = arith.addf %20, %23 : vector<16x64xf32>
    %c0_22 = arith.constant 0 : index
    %c0_23 = arith.constant 0 : index
    %c0_24 = arith.constant 0 : index
    %25 = vector.load %arg11[%c0_22, %c0_23, %c0_24] : memref<1x64x64xf32, #tpu.memory_space<vmem>>, vector<1x64x64xf32>
    %26 = vector.shape_cast %25 : vector<1x64x64xf32> to vector<64x64xf32>
    %cst_25 = arith.constant 0.000000e+00 : f32
    %27 = vector.broadcast %cst_25 : f32 to vector<8x64xf32>
    %28 = vector.extract_strided_slice %10 {offsets = [0, 0], sizes = [8, 16], strides = [1, 1]} : vector<16x64xf32> to vector<8x16xf32>
    %29 = vector.extract_strided_slice %17 {offsets = [0, 0], sizes = [8, 16], strides = [1, 1]} : vector<16x64xf32> to vector<8x16xf32>
    %30 = vector.extract_strided_slice %24 {offsets = [0, 0], sizes = [8, 16], strides = [1, 1]} : vector<16x64xf32> to vector<8x16xf32>
    %cst_26 = arith.constant dense<0.000000e+00> : vector<8x8xf32>
    %31 = tpu.matmul %28, %29, %cst_26 {dimension_numbers = #tpu.dot_dimension_numbers<[1], [1], [0], [0], [0, 0, 1, 0], [], []>} : vector<8x16xf32>, vector<8x16xf32>, vector<8x8xf32> -> vector<8x8xf32>
    %cst_27 = arith.constant 2.500000e-01 : f32
    %32 = vector.broadcast %cst_27 : f32 to vector<8x8xf32>
    %33 = arith.mulf %31, %32 : vector<8x8xf32>
    %cst_28 = arith.constant dense<0xFF800000> : vector<8xf32>
    %34 = vector.multi_reduction <maximumf>, %33, %cst_28 [1] : vector<8x8xf32> to vector<8xf32>
    %35 = vector.shape_cast %34 : vector<8xf32> to vector<8x1xf32>
    %36 = vector.broadcast %35 : vector<8x1xf32> to vector<8x8xf32>
    %37 = arith.subf %33, %36 : vector<8x8xf32>
    %38 = math.exp %37 : vector<8x8xf32>
    %cst_29 = arith.constant dense<0.000000e+00> : vector<8xf32>
    %39 = vector.multi_reduction <add>, %38, %cst_29 [1] : vector<8x8xf32> to vector<8xf32>
    %40 = vector.shape_cast %39 : vector<8xf32> to vector<8x1xf32>
    %41 = vector.broadcast %40 : vector<8x1xf32> to vector<8x8xf32>
    %42 = arith.divf %38, %41 : vector<8x8xf32>
    %cst_30 = arith.constant dense<0.000000e+00> : vector<8x16xf32>
    %43 = tpu.matmul %42, %30, %cst_30 {dimension_numbers = #tpu.dot_dimension_numbers<[1], [0], [0], [1], [0, 0, 1, 1], [], []>} : vector<8x8xf32>, vector<8x16xf32>, vector<8x16xf32> -> vector<8x16xf32>
    %44 = vector.extract_strided_slice %26 {offsets = [0, 0], sizes = [16, 64], strides = [1, 1]} : vector<64x64xf32> to vector<16x64xf32>
    %cst_31 = arith.constant dense<0.000000e+00> : vector<8x64xf32>
    %45 = tpu.matmul %43, %44, %cst_31 {dimension_numbers = #tpu.dot_dimension_numbers<[1], [0], [0], [1], [0, 0, 1, 1], [], []>} : vector<8x16xf32>, vector<16x64xf32>, vector<8x64xf32> -> vector<8x64xf32>
    %46 = arith.addf %27, %45 : vector<8x64xf32>
    %47 = vector.extract_strided_slice %10 {offsets = [0, 16], sizes = [8, 16], strides = [1, 1]} : vector<16x64xf32> to vector<8x16xf32>
    %48 = vector.extract_strided_slice %17 {offsets = [0, 16], sizes = [8, 16], strides = [1, 1]} : vector<16x64xf32> to vector<8x16xf32>
    %49 = vector.extract_strided_slice %24 {offsets = [0, 16], sizes = [8, 16], strides = [1, 1]} : vector<16x64xf32> to vector<8x16xf32>
    %cst_32 = arith.constant dense<0.000000e+00> : vector<8x8xf32>
    %50 = tpu.matmul %47, %48, %cst_32 {dimension_numbers = #tpu.dot_dimension_numbers<[1], [1], [0], [0], [0, 0, 1, 0], [], []>} : vector<8x16xf32>, vector<8x16xf32>, vector<8x8xf32> -> vector<8x8xf32>
    %cst_33 = arith.constant 2.500000e-01 : f32
    %51 = vector.broadcast %cst_33 : f32 to vector<8x8xf32>
    %52 = arith.mulf %50, %51 : vector<8x8xf32>
    %cst_34 = arith.constant dense<0xFF800000> : vector<8xf32>
    %53 = vector.multi_reduction <maximumf>, %52, %cst_34 [1] : vector<8x8xf32> to vector<8xf32>
    %54 = vector.shape_cast %53 : vector<8xf32> to vector<8x1xf32>
    %55 = vector.broadcast %54 : vector<8x1xf32> to vector<8x8xf32>
    %56 = arith.subf %52, %55 : vector<8x8xf32>
    %57 = math.exp %56 : vector<8x8xf32>
    %cst_35 = arith.constant dense<0.000000e+00> : vector<8xf32>
    %58 = vector.multi_reduction <add>, %57, %cst_35 [1] : vector<8x8xf32> to vector<8xf32>
    %59 = vector.shape_cast %58 : vector<8xf32> to vector<8x1xf32>
    %60 = vector.broadcast %59 : vector<8x1xf32> to vector<8x8xf32>
    %61 = arith.divf %57, %60 : vector<8x8xf32>
    %cst_36 = arith.constant dense<0.000000e+00> : vector<8x16xf32>
    %62 = tpu.matmul %61, %49, %cst_36 {dimension_numbers = #tpu.dot_dimension_numbers<[1], [0], [0], [1], [0, 0, 1, 1], [], []>} : vector<8x8xf32>, vector<8x16xf32>, vector<8x16xf32> -> vector<8x16xf32>
    %63 = vector.extract_strided_slice %26 {offsets = [16, 0], sizes = [16, 64], strides = [1, 1]} : vector<64x64xf32> to vector<16x64xf32>
    %cst_37 = arith.constant dense<0.000000e+00> : vector<8x64xf32>
    %64 = tpu.matmul %62, %63, %cst_37 {dimension_numbers = #tpu.dot_dimension_numbers<[1], [0], [0], [1], [0, 0, 1, 1], [], []>} : vector<8x16xf32>, vector<16x64xf32>, vector<8x64xf32> -> vector<8x64xf32>
    %65 = arith.addf %46, %64 : vector<8x64xf32>
    %66 = vector.extract_strided_slice %10 {offsets = [0, 32], sizes = [8, 16], strides = [1, 1]} : vector<16x64xf32> to vector<8x16xf32>
    %67 = vector.extract_strided_slice %17 {offsets = [0, 32], sizes = [8, 16], strides = [1, 1]} : vector<16x64xf32> to vector<8x16xf32>
    %68 = vector.extract_strided_slice %24 {offsets = [0, 32], sizes = [8, 16], strides = [1, 1]} : vector<16x64xf32> to vector<8x16xf32>
    %cst_38 = arith.constant dense<0.000000e+00> : vector<8x8xf32>
    %69 = tpu.matmul %66, %67, %cst_38 {dimension_numbers = #tpu.dot_dimension_numbers<[1], [1], [0], [0], [0, 0, 1, 0], [], []>} : vector<8x16xf32>, vector<8x16xf32>, vector<8x8xf32> -> vector<8x8xf32>
    %cst_39 = arith.constant 2.500000e-01 : f32
    %70 = vector.broadcast %cst_39 : f32 to vector<8x8xf32>
    %71 = arith.mulf %69, %70 : vector<8x8xf32>
    %cst_40 = arith.constant dense<0xFF800000> : vector<8xf32>
    %72 = vector.multi_reduction <maximumf>, %71, %cst_40 [1] : vector<8x8xf32> to vector<8xf32>
    %73 = vector.shape_cast %72 : vector<8xf32> to vector<8x1xf32>
    %74 = vector.broadcast %73 : vector<8x1xf32> to vector<8x8xf32>
    %75 = arith.subf %71, %74 : vector<8x8xf32>
    %76 = math.exp %75 : vector<8x8xf32>
    %cst_41 = arith.constant dense<0.000000e+00> : vector<8xf32>
    %77 = vector.multi_reduction <add>, %76, %cst_41 [1] : vector<8x8xf32> to vector<8xf32>
    %78 = vector.shape_cast %77 : vector<8xf32> to vector<8x1xf32>
    %79 = vector.broadcast %78 : vector<8x1xf32> to vector<8x8xf32>
    %80 = arith.divf %76, %79 : vector<8x8xf32>
    %cst_42 = arith.constant dense<0.000000e+00> : vector<8x16xf32>
    %81 = tpu.matmul %80, %68, %cst_42 {dimension_numbers = #tpu.dot_dimension_numbers<[1], [0], [0], [1], [0, 0, 1, 1], [], []>} : vector<8x8xf32>, vector<8x16xf32>, vector<8x16xf32> -> vector<8x16xf32>
    %82 = vector.extract_strided_slice %26 {offsets = [32, 0], sizes = [16, 64], strides = [1, 1]} : vector<64x64xf32> to vector<16x64xf32>
    %cst_43 = arith.constant dense<0.000000e+00> : vector<8x64xf32>
    %83 = tpu.matmul %81, %82, %cst_43 {dimension_numbers = #tpu.dot_dimension_numbers<[1], [0], [0], [1], [0, 0, 1, 1], [], []>} : vector<8x16xf32>, vector<16x64xf32>, vector<8x64xf32> -> vector<8x64xf32>
    %84 = arith.addf %65, %83 : vector<8x64xf32>
    %85 = vector.extract_strided_slice %10 {offsets = [0, 48], sizes = [8, 16], strides = [1, 1]} : vector<16x64xf32> to vector<8x16xf32>
    %86 = vector.extract_strided_slice %17 {offsets = [0, 48], sizes = [8, 16], strides = [1, 1]} : vector<16x64xf32> to vector<8x16xf32>
    %87 = vector.extract_strided_slice %24 {offsets = [0, 48], sizes = [8, 16], strides = [1, 1]} : vector<16x64xf32> to vector<8x16xf32>
    %cst_44 = arith.constant dense<0.000000e+00> : vector<8x8xf32>
    %88 = tpu.matmul %85, %86, %cst_44 {dimension_numbers = #tpu.dot_dimension_numbers<[1], [1], [0], [0], [0, 0, 1, 0], [], []>} : vector<8x16xf32>, vector<8x16xf32>, vector<8x8xf32> -> vector<8x8xf32>
    %cst_45 = arith.constant 2.500000e-01 : f32
    %89 = vector.broadcast %cst_45 : f32 to vector<8x8xf32>
    %90 = arith.mulf %88, %89 : vector<8x8xf32>
    %cst_46 = arith.constant dense<0xFF800000> : vector<8xf32>
    %91 = vector.multi_reduction <maximumf>, %90, %cst_46 [1] : vector<8x8xf32> to vector<8xf32>
    %92 = vector.shape_cast %91 : vector<8xf32> to vector<8x1xf32>
    %93 = vector.broadcast %92 : vector<8x1xf32> to vector<8x8xf32>
    %94 = arith.subf %90, %93 : vector<8x8xf32>
    %95 = math.exp %94 : vector<8x8xf32>
    %cst_47 = arith.constant dense<0.000000e+00> : vector<8xf32>
    %96 = vector.multi_reduction <add>, %95, %cst_47 [1] : vector<8x8xf32> to vector<8xf32>
    %97 = vector.shape_cast %96 : vector<8xf32> to vector<8x1xf32>
    %98 = vector.broadcast %97 : vector<8x1xf32> to vector<8x8xf32>
    %99 = arith.divf %95, %98 : vector<8x8xf32>
    %cst_48 = arith.constant dense<0.000000e+00> : vector<8x16xf32>
    %100 = tpu.matmul %99, %87, %cst_48 {dimension_numbers = #tpu.dot_dimension_numbers<[1], [0], [0], [1], [0, 0, 1, 1], [], []>} : vector<8x8xf32>, vector<8x16xf32>, vector<8x16xf32> -> vector<8x16xf32>
    %101 = vector.extract_strided_slice %26 {offsets = [48, 0], sizes = [16, 64], strides = [1, 1]} : vector<64x64xf32> to vector<16x64xf32>
    %cst_49 = arith.constant dense<0.000000e+00> : vector<8x64xf32>
    %102 = tpu.matmul %100, %101, %cst_49 {dimension_numbers = #tpu.dot_dimension_numbers<[1], [0], [0], [1], [0, 0, 1, 1], [], []>} : vector<8x16xf32>, vector<16x64xf32>, vector<8x64xf32> -> vector<8x64xf32>
    %103 = arith.addf %84, %102 : vector<8x64xf32>
    %cst_50 = arith.constant 0.000000e+00 : f32
    %104 = vector.broadcast %cst_50 : f32 to vector<8x64xf32>
    %105 = vector.extract_strided_slice %10 {offsets = [8, 0], sizes = [8, 16], strides = [1, 1]} : vector<16x64xf32> to vector<8x16xf32>
    %106 = vector.extract_strided_slice %17 {offsets = [8, 0], sizes = [8, 16], strides = [1, 1]} : vector<16x64xf32> to vector<8x16xf32>
    %107 = vector.extract_strided_slice %24 {offsets = [8, 0], sizes = [8, 16], strides = [1, 1]} : vector<16x64xf32> to vector<8x16xf32>
    %cst_51 = arith.constant dense<0.000000e+00> : vector<8x8xf32>
    %108 = tpu.matmul %105, %106, %cst_51 {dimension_numbers = #tpu.dot_dimension_numbers<[1], [1], [0], [0], [0, 0, 1, 0], [], []>} : vector<8x16xf32>, vector<8x16xf32>, vector<8x8xf32> -> vector<8x8xf32>
    %cst_52 = arith.constant 2.500000e-01 : f32
    %109 = vector.broadcast %cst_52 : f32 to vector<8x8xf32>
    %110 = arith.mulf %108, %109 : vector<8x8xf32>
    %cst_53 = arith.constant dense<0xFF800000> : vector<8xf32>
    %111 = vector.multi_reduction <maximumf>, %110, %cst_53 [1] : vector<8x8xf32> to vector<8xf32>
    %112 = vector.shape_cast %111 : vector<8xf32> to vector<8x1xf32>
    %113 = vector.broadcast %112 : vector<8x1xf32> to vector<8x8xf32>
    %114 = arith.subf %110, %113 : vector<8x8xf32>
    %115 = math.exp %114 : vector<8x8xf32>
    %cst_54 = arith.constant dense<0.000000e+00> : vector<8xf32>
    %116 = vector.multi_reduction <add>, %115, %cst_54 [1] : vector<8x8xf32> to vector<8xf32>
    %117 = vector.shape_cast %116 : vector<8xf32> to vector<8x1xf32>
    %118 = vector.broadcast %117 : vector<8x1xf32> to vector<8x8xf32>
    %119 = arith.divf %115, %118 : vector<8x8xf32>
    %cst_55 = arith.constant dense<0.000000e+00> : vector<8x16xf32>
    %120 = tpu.matmul %119, %107, %cst_55 {dimension_numbers = #tpu.dot_dimension_numbers<[1], [0], [0], [1], [0, 0, 1, 1], [], []>} : vector<8x8xf32>, vector<8x16xf32>, vector<8x16xf32> -> vector<8x16xf32>
    %121 = vector.extract_strided_slice %26 {offsets = [0, 0], sizes = [16, 64], strides = [1, 1]} : vector<64x64xf32> to vector<16x64xf32>
    %cst_56 = arith.constant dense<0.000000e+00> : vector<8x64xf32>
    %122 = tpu.matmul %120, %121, %cst_56 {dimension_numbers = #tpu.dot_dimension_numbers<[1], [0], [0], [1], [0, 0, 1, 1], [], []>} : vector<8x16xf32>, vector<16x64xf32>, vector<8x64xf32> -> vector<8x64xf32>
    %123 = arith.addf %104, %122 : vector<8x64xf32>
    %124 = vector.extract_strided_slice %10 {offsets = [8, 16], sizes = [8, 16], strides = [1, 1]} : vector<16x64xf32> to vector<8x16xf32>
    %125 = vector.extract_strided_slice %17 {offsets = [8, 16], sizes = [8, 16], strides = [1, 1]} : vector<16x64xf32> to vector<8x16xf32>
    %126 = vector.extract_strided_slice %24 {offsets = [8, 16], sizes = [8, 16], strides = [1, 1]} : vector<16x64xf32> to vector<8x16xf32>
    %cst_57 = arith.constant dense<0.000000e+00> : vector<8x8xf32>
    %127 = tpu.matmul %124, %125, %cst_57 {dimension_numbers = #tpu.dot_dimension_numbers<[1], [1], [0], [0], [0, 0, 1, 0], [], []>} : vector<8x16xf32>, vector<8x16xf32>, vector<8x8xf32> -> vector<8x8xf32>
    %cst_58 = arith.constant 2.500000e-01 : f32
    %128 = vector.broadcast %cst_58 : f32 to vector<8x8xf32>
    %129 = arith.mulf %127, %128 : vector<8x8xf32>
    %cst_59 = arith.constant dense<0xFF800000> : vector<8xf32>
    %130 = vector.multi_reduction <maximumf>, %129, %cst_59 [1] : vector<8x8xf32> to vector<8xf32>
    %131 = vector.shape_cast %130 : vector<8xf32> to vector<8x1xf32>
    %132 = vector.broadcast %131 : vector<8x1xf32> to vector<8x8xf32>
    %133 = arith.subf %129, %132 : vector<8x8xf32>
    %134 = math.exp %133 : vector<8x8xf32>
    %cst_60 = arith.constant dense<0.000000e+00> : vector<8xf32>
    %135 = vector.multi_reduction <add>, %134, %cst_60 [1] : vector<8x8xf32> to vector<8xf32>
    %136 = vector.shape_cast %135 : vector<8xf32> to vector<8x1xf32>
    %137 = vector.broadcast %136 : vector<8x1xf32> to vector<8x8xf32>
    %138 = arith.divf %134, %137 : vector<8x8xf32>
    %cst_61 = arith.constant dense<0.000000e+00> : vector<8x16xf32>
    %139 = tpu.matmul %138, %126, %cst_61 {dimension_numbers = #tpu.dot_dimension_numbers<[1], [0], [0], [1], [0, 0, 1, 1], [], []>} : vector<8x8xf32>, vector<8x16xf32>, vector<8x16xf32> -> vector<8x16xf32>
    %140 = vector.extract_strided_slice %26 {offsets = [16, 0], sizes = [16, 64], strides = [1, 1]} : vector<64x64xf32> to vector<16x64xf32>
    %cst_62 = arith.constant dense<0.000000e+00> : vector<8x64xf32>
    %141 = tpu.matmul %139, %140, %cst_62 {dimension_numbers = #tpu.dot_dimension_numbers<[1], [0], [0], [1], [0, 0, 1, 1], [], []>} : vector<8x16xf32>, vector<16x64xf32>, vector<8x64xf32> -> vector<8x64xf32>
    %142 = arith.addf %123, %141 : vector<8x64xf32>
    %143 = vector.extract_strided_slice %10 {offsets = [8, 32], sizes = [8, 16], strides = [1, 1]} : vector<16x64xf32> to vector<8x16xf32>
    %144 = vector.extract_strided_slice %17 {offsets = [8, 32], sizes = [8, 16], strides = [1, 1]} : vector<16x64xf32> to vector<8x16xf32>
    %145 = vector.extract_strided_slice %24 {offsets = [8, 32], sizes = [8, 16], strides = [1, 1]} : vector<16x64xf32> to vector<8x16xf32>
    %cst_63 = arith.constant dense<0.000000e+00> : vector<8x8xf32>
    %146 = tpu.matmul %143, %144, %cst_63 {dimension_numbers = #tpu.dot_dimension_numbers<[1], [1], [0], [0], [0, 0, 1, 0], [], []>} : vector<8x16xf32>, vector<8x16xf32>, vector<8x8xf32> -> vector<8x8xf32>
    %cst_64 = arith.constant 2.500000e-01 : f32
    %147 = vector.broadcast %cst_64 : f32 to vector<8x8xf32>
    %148 = arith.mulf %146, %147 : vector<8x8xf32>
    %cst_65 = arith.constant dense<0xFF800000> : vector<8xf32>
    %149 = vector.multi_reduction <maximumf>, %148, %cst_65 [1] : vector<8x8xf32> to vector<8xf32>
    %150 = vector.shape_cast %149 : vector<8xf32> to vector<8x1xf32>
    %151 = vector.broadcast %150 : vector<8x1xf32> to vector<8x8xf32>
    %152 = arith.subf %148, %151 : vector<8x8xf32>
    %153 = math.exp %152 : vector<8x8xf32>
    %cst_66 = arith.constant dense<0.000000e+00> : vector<8xf32>
    %154 = vector.multi_reduction <add>, %153, %cst_66 [1] : vector<8x8xf32> to vector<8xf32>
    %155 = vector.shape_cast %154 : vector<8xf32> to vector<8x1xf32>
    %156 = vector.broadcast %155 : vector<8x1xf32> to vector<8x8xf32>
    %157 = arith.divf %153, %156 : vector<8x8xf32>
    %cst_67 = arith.constant dense<0.000000e+00> : vector<8x16xf32>
    %158 = tpu.matmul %157, %145, %cst_67 {dimension_numbers = #tpu.dot_dimension_numbers<[1], [0], [0], [1], [0, 0, 1, 1], [], []>} : vector<8x8xf32>, vector<8x16xf32>, vector<8x16xf32> -> vector<8x16xf32>
    %159 = vector.extract_strided_slice %26 {offsets = [32, 0], sizes = [16, 64], strides = [1, 1]} : vector<64x64xf32> to vector<16x64xf32>
    %cst_68 = arith.constant dense<0.000000e+00> : vector<8x64xf32>
    %160 = tpu.matmul %158, %159, %cst_68 {dimension_numbers = #tpu.dot_dimension_numbers<[1], [0], [0], [1], [0, 0, 1, 1], [], []>} : vector<8x16xf32>, vector<16x64xf32>, vector<8x64xf32> -> vector<8x64xf32>
    %161 = arith.addf %142, %160 : vector<8x64xf32>
    %162 = vector.extract_strided_slice %10 {offsets = [8, 48], sizes = [8, 16], strides = [1, 1]} : vector<16x64xf32> to vector<8x16xf32>
    %163 = vector.extract_strided_slice %17 {offsets = [8, 48], sizes = [8, 16], strides = [1, 1]} : vector<16x64xf32> to vector<8x16xf32>
    %164 = vector.extract_strided_slice %24 {offsets = [8, 48], sizes = [8, 16], strides = [1, 1]} : vector<16x64xf32> to vector<8x16xf32>
    %cst_69 = arith.constant dense<0.000000e+00> : vector<8x8xf32>
    %165 = tpu.matmul %162, %163, %cst_69 {dimension_numbers = #tpu.dot_dimension_numbers<[1], [1], [0], [0], [0, 0, 1, 0], [], []>} : vector<8x16xf32>, vector<8x16xf32>, vector<8x8xf32> -> vector<8x8xf32>
    %cst_70 = arith.constant 2.500000e-01 : f32
    %166 = vector.broadcast %cst_70 : f32 to vector<8x8xf32>
    %167 = arith.mulf %165, %166 : vector<8x8xf32>
    %cst_71 = arith.constant dense<0xFF800000> : vector<8xf32>
    %168 = vector.multi_reduction <maximumf>, %167, %cst_71 [1] : vector<8x8xf32> to vector<8xf32>
    %169 = vector.shape_cast %168 : vector<8xf32> to vector<8x1xf32>
    %170 = vector.broadcast %169 : vector<8x1xf32> to vector<8x8xf32>
    %171 = arith.subf %167, %170 : vector<8x8xf32>
    %172 = math.exp %171 : vector<8x8xf32>
    %cst_72 = arith.constant dense<0.000000e+00> : vector<8xf32>
    %173 = vector.multi_reduction <add>, %172, %cst_72 [1] : vector<8x8xf32> to vector<8xf32>
    %174 = vector.shape_cast %173 : vector<8xf32> to vector<8x1xf32>
    %175 = vector.broadcast %174 : vector<8x1xf32> to vector<8x8xf32>
    %176 = arith.divf %172, %175 : vector<8x8xf32>
    %cst_73 = arith.constant dense<0.000000e+00> : vector<8x16xf32>
    %177 = tpu.matmul %176, %164, %cst_73 {dimension_numbers = #tpu.dot_dimension_numbers<[1], [0], [0], [1], [0, 0, 1, 1], [], []>} : vector<8x8xf32>, vector<8x16xf32>, vector<8x16xf32> -> vector<8x16xf32>
    %178 = vector.extract_strided_slice %26 {offsets = [48, 0], sizes = [16, 64], strides = [1, 1]} : vector<64x64xf32> to vector<16x64xf32>
    %cst_74 = arith.constant dense<0.000000e+00> : vector<8x64xf32>
    %179 = tpu.matmul %177, %178, %cst_74 {dimension_numbers = #tpu.dot_dimension_numbers<[1], [0], [0], [1], [0, 0, 1, 1], [], []>} : vector<8x16xf32>, vector<16x64xf32>, vector<8x64xf32> -> vector<8x64xf32>
    %180 = arith.addf %161, %179 : vector<8x64xf32>
    %181 = tpu.concatenate %103, %180 in 0 : vector<8x64xf32>, vector<8x64xf32> -> vector<16x64xf32>
    %c0_75 = arith.constant 0 : index
    %c0_76 = arith.constant 0 : index
    %c0_77 = arith.constant 0 : index
    %182 = vector.load %arg12[%c0_75, %c0_76, %c0_77] : memref<1x1x64xf32, #tpu.memory_space<vmem>>, vector<1x1x64xf32>
    %183 = vector.shape_cast %182 : vector<1x1x64xf32> to vector<1x64xf32>
    %184 = vector.broadcast %183 : vector<1x64xf32> to vector<16x64xf32>
    %185 = arith.addf %181, %184 : vector<16x64xf32>
    %186 = arith.addf %3, %185 : vector<16x64xf32>
    %c0_78 = arith.constant 0 : index
    %c0_79 = arith.constant 0 : index
    %c0_80 = arith.constant 0 : index
    %187 = vector.load %arg17[%c0_78, %c0_79, %c0_80] : memref<1x1x64xf32, #tpu.memory_space<vmem>>, vector<1x1x64xf32>
    %188 = vector.shape_cast %187 : vector<1x1x64xf32> to vector<1x64xf32>
    %c0_81 = arith.constant 0 : index
    %c0_82 = arith.constant 0 : index
    %c0_83 = arith.constant 0 : index
    %189 = vector.load %arg18[%c0_81, %c0_82, %c0_83] : memref<1x1x64xf32, #tpu.memory_space<vmem>>, vector<1x1x64xf32>
    %190 = vector.shape_cast %189 : vector<1x1x64xf32> to vector<1x64xf32>
    %cst_84 = arith.constant dense<0.000000e+00> : vector<16xf32>
    %191 = vector.multi_reduction <add>, %186, %cst_84 [1] : vector<16x64xf32> to vector<16xf32>
    %192 = vector.shape_cast %191 : vector<16xf32> to vector<16x1xf32>
    %cst_85 = arith.constant 6.400000e+01 : f32
    %193 = vector.broadcast %cst_85 : f32 to vector<16x1xf32>
    %194 = arith.divf %192, %193 : vector<16x1xf32>
    %195 = vector.broadcast %194 : vector<16x1xf32> to vector<16x64xf32>
    %196 = arith.subf %186, %195 : vector<16x64xf32>
    %197 = arith.mulf %196, %196 : vector<16x64xf32>
    %cst_86 = arith.constant dense<0.000000e+00> : vector<16xf32>
    %198 = vector.multi_reduction <add>, %197, %cst_86 [1] : vector<16x64xf32> to vector<16xf32>
    %199 = vector.shape_cast %198 : vector<16xf32> to vector<16x1xf32>
    %cst_87 = arith.constant 6.400000e+01 : f32
    %200 = vector.broadcast %cst_87 : f32 to vector<16x1xf32>
    %201 = arith.divf %199, %200 : vector<16x1xf32>
    %202 = vector.broadcast %194 : vector<16x1xf32> to vector<16x64xf32>
    %203 = arith.subf %186, %202 : vector<16x64xf32>
    %cst_88 = arith.constant 9.99999974E-6 : f32
    %204 = vector.broadcast %cst_88 : f32 to vector<16x1xf32>
    %205 = arith.addf %201, %204 : vector<16x1xf32>
    %206 = math.rsqrt %205 : vector<16x1xf32>
    %207 = vector.broadcast %206 : vector<16x1xf32> to vector<16x64xf32>
    %208 = arith.mulf %203, %207 : vector<16x64xf32>
    %209 = vector.broadcast %188 : vector<1x64xf32> to vector<16x64xf32>
    %210 = arith.mulf %208, %209 : vector<16x64xf32>
    %211 = vector.broadcast %190 : vector<1x64xf32> to vector<16x64xf32>
    %212 = arith.addf %210, %211 : vector<16x64xf32>
    %c0_89 = arith.constant 0 : index
    %c0_90 = arith.constant 0 : index
    %c0_91 = arith.constant 0 : index
    %213 = vector.load %arg13[%c0_89, %c0_90, %c0_91] : memref<1x64x128xf32, #tpu.memory_space<vmem>>, vector<1x64x128xf32>
    %214 = vector.shape_cast %213 : vector<1x64x128xf32> to vector<64x128xf32>
    %cst_92 = arith.constant dense<0.000000e+00> : vector<16x128xf32>
    %215 = tpu.matmul %212, %214, %cst_92 {dimension_numbers = #tpu.dot_dimension_numbers<[1], [0], [0], [1], [0, 0, 1, 1], [], []>} : vector<16x64xf32>, vector<64x128xf32>, vector<16x128xf32> -> vector<16x128xf32>
    %c0_93 = arith.constant 0 : index
    %c0_94 = arith.constant 0 : index
    %c0_95 = arith.constant 0 : index
    %216 = vector.load %arg14[%c0_93, %c0_94, %c0_95] : memref<1x1x128xf32, #tpu.memory_space<vmem>>, vector<1x1x128xf32>
    %217 = vector.shape_cast %216 : vector<1x1x128xf32> to vector<1x128xf32>
    %218 = vector.broadcast %217 : vector<1x128xf32> to vector<16x128xf32>
    %219 = arith.addf %215, %218 : vector<16x128xf32>
    %cst_96 = arith.constant 0.000000e+00 : f32
    %220 = vector.broadcast %cst_96 : f32 to vector<16x128xf32>
    %221 = arith.maximumf %219, %220 : vector<16x128xf32>
    %c0_97 = arith.constant 0 : index
    %c0_98 = arith.constant 0 : index
    %c0_99 = arith.constant 0 : index
    %222 = vector.load %arg15[%c0_97, %c0_98, %c0_99] : memref<1x128x64xf32, #tpu.memory_space<vmem>>, vector<1x128x64xf32>
    %223 = vector.shape_cast %222 : vector<1x128x64xf32> to vector<128x64xf32>
    %cst_100 = arith.constant dense<0.000000e+00> : vector<16x64xf32>
    %224 = tpu.matmul %221, %223, %cst_100 {dimension_numbers = #tpu.dot_dimension_numbers<[1], [0], [0], [1], [0, 0, 1, 1], [], []>} : vector<16x128xf32>, vector<128x64xf32>, vector<16x64xf32> -> vector<16x64xf32>
    %c0_101 = arith.constant 0 : index
    %c0_102 = arith.constant 0 : index
    %c0_103 = arith.constant 0 : index
    %225 = vector.load %arg16[%c0_101, %c0_102, %c0_103] : memref<1x1x64xf32, #tpu.memory_space<vmem>>, vector<1x1x64xf32>
    %226 = vector.shape_cast %225 : vector<1x1x64xf32> to vector<1x64xf32>
    %227 = vector.broadcast %226 : vector<1x64xf32> to vector<16x64xf32>
    %228 = arith.addf %224, %227 : vector<16x64xf32>
    %229 = arith.addf %212, %228 : vector<16x64xf32>
    %c0_104 = arith.constant 0 : index
    %c0_105 = arith.constant 0 : index
    %c0_106 = arith.constant 0 : index
    %230 = vector.load %arg19[%c0_104, %c0_105, %c0_106] : memref<1x1x64xf32, #tpu.memory_space<vmem>>, vector<1x1x64xf32>
    %231 = vector.shape_cast %230 : vector<1x1x64xf32> to vector<1x64xf32>
    %c0_107 = arith.constant 0 : index
    %c0_108 = arith.constant 0 : index
    %c0_109 = arith.constant 0 : index
    %232 = vector.load %arg20[%c0_107, %c0_108, %c0_109] : memref<1x1x64xf32, #tpu.memory_space<vmem>>, vector<1x1x64xf32>
    %233 = vector.shape_cast %232 : vector<1x1x64xf32> to vector<1x64xf32>
    %cst_110 = arith.constant dense<0.000000e+00> : vector<16xf32>
    %234 = vector.multi_reduction <add>, %229, %cst_110 [1] : vector<16x64xf32> to vector<16xf32>
    %235 = vector.shape_cast %234 : vector<16xf32> to vector<16x1xf32>
    %cst_111 = arith.constant 6.400000e+01 : f32
    %236 = vector.broadcast %cst_111 : f32 to vector<16x1xf32>
    %237 = arith.divf %235, %236 : vector<16x1xf32>
    %238 = vector.broadcast %237 : vector<16x1xf32> to vector<16x64xf32>
    %239 = arith.subf %229, %238 : vector<16x64xf32>
    %240 = arith.mulf %239, %239 : vector<16x64xf32>
    %cst_112 = arith.constant dense<0.000000e+00> : vector<16xf32>
    %241 = vector.multi_reduction <add>, %240, %cst_112 [1] : vector<16x64xf32> to vector<16xf32>
    %242 = vector.shape_cast %241 : vector<16xf32> to vector<16x1xf32>
    %cst_113 = arith.constant 6.400000e+01 : f32
    %243 = vector.broadcast %cst_113 : f32 to vector<16x1xf32>
    %244 = arith.divf %242, %243 : vector<16x1xf32>
    %245 = vector.broadcast %237 : vector<16x1xf32> to vector<16x64xf32>
    %246 = arith.subf %229, %245 : vector<16x64xf32>
    %cst_114 = arith.constant 9.99999974E-6 : f32
    %247 = vector.broadcast %cst_114 : f32 to vector<16x1xf32>
    %248 = arith.addf %244, %247 : vector<16x1xf32>
    %249 = math.rsqrt %248 : vector<16x1xf32>
    %250 = vector.broadcast %249 : vector<16x1xf32> to vector<16x64xf32>
    %251 = arith.mulf %246, %250 : vector<16x64xf32>
    %252 = vector.broadcast %231 : vector<1x64xf32> to vector<16x64xf32>
    %253 = arith.mulf %251, %252 : vector<16x64xf32>
    %254 = vector.broadcast %233 : vector<1x64xf32> to vector<16x64xf32>
    %255 = arith.addf %253, %254 : vector<16x64xf32>
    %c0_115 = arith.constant 0 : index
    %c0_116 = arith.constant 0 : index
    %256 = vector.load %arg24[%c0_115, %c0_116] : memref<16x64xf32, #tpu.memory_space<vmem>>, vector<16x64xf32>
    tpu.vector_store %arg24[%c0_115, %c0_116], %255 {strides = array<i32>} : memref<16x64xf32, #tpu.memory_space<vmem>>, vector<16x64xf32>,
    %c1_i32 = arith.constant 1 : i32
    %257 = arith.cmpi eq, %arg1, %c1_i32 : i32
    %258 = arith.extui %257 : i1 to i32
    %c0_i32_117 = arith.constant 0 : i32
    %259 = arith.cmpi ne, %258, %c0_i32_117 : i32
    scf.if %259 {
      %c0_118 = arith.constant 0 : index
      %c0_119 = arith.constant 0 : index
      %260 = vector.load %arg21[%c0_118, %c0_119] : memref<64x8xf32, #tpu.memory_space<vmem>>, vector<64x8xf32>
      %cst_120 = arith.constant dense<0.000000e+00> : vector<16x8xf32>
      %261 = tpu.matmul %255, %260, %cst_120 {dimension_numbers = #tpu.dot_dimension_numbers<[1], [0], [0], [1], [0, 0, 1, 1], [], []>} : vector<16x64xf32>, vector<64x8xf32>, vector<16x8xf32> -> vector<16x8xf32>
      %c0_121 = arith.constant 0 : index
      %c0_122 = arith.constant 0 : index
      %262 = vector.load %arg22[%c0_121, %c0_122] : memref<1x8xf32, #tpu.memory_space<vmem>>, vector<1x8xf32>
      %263 = vector.broadcast %262 : vector<1x8xf32> to vector<16x8xf32>
      %264 = arith.addf %261, %263 : vector<16x8xf32>
      %265 = vector.extract_strided_slice %264 {offsets = [0, 0], sizes = [8, 8], strides = [1, 1]} : vector<16x8xf32> to vector<8x8xf32>
      %266 = vector.shape_cast %265 : vector<8x8xf32> to vector<8x1x8xf32>
      %c0_123 = arith.constant 0 : index
      %c0_124 = arith.constant 0 : index
      %c0_125 = arith.constant 0 : index
      %267 = vector.load %arg23[%c0_123, %c0_124, %c0_125] : memref<8x2x8xf32, #tpu.memory_space<vmem>>, vector<8x1x8xf32>
      tpu.vector_store %arg23[%c0_123, %c0_124, %c0_125], %266 {strides = array<i32>} : memref<8x2x8xf32, #tpu.memory_space<vmem>>, vector<8x1x8xf32>,
      %268 = vector.extract_strided_slice %264 {offsets = [8, 0], sizes = [8, 8], strides = [1, 1]} : vector<16x8xf32> to vector<8x8xf32>
      %269 = vector.shape_cast %268 : vector<8x8xf32> to vector<8x1x8xf32>
      %c0_126 = arith.constant 0 : index
      %c1 = arith.constant 1 : index
      %c0_127 = arith.constant 0 : index
      %270 = vector.load %arg23[%c0_126, %c1, %c0_127] : memref<8x2x8xf32, #tpu.memory_space<vmem>>, vector<8x1x8xf32>
      tpu.vector_store %arg23[%c0_126, %c1, %c0_127], %269 {strides = array<i32>} : memref<8x2x8xf32, #tpu.memory_space<vmem>>, vector<8x1x8xf32>,
    } else {
    }
    return
  }
  func.func @transform_0(%arg0: i32, %arg1: i32) -> (i32, i32, i32) {
    %c0_i32 = arith.constant 0 : i32
    %c0_i32_0 = arith.constant 0 : i32
    %c0_i32_1 = arith.constant 0 : i32
    return %c0_i32, %arg0, %c0_i32_0 : i32, i32, i32
  }
  func.func @transform_1(%arg0: i32, %arg1: i32) -> (i32, i32) {
    %c0_i32 = arith.constant 0 : i32
    %c0_i32_0 = arith.constant 0 : i32
    %c0_i32_1 = arith.constant 0 : i32
    return %c0_i32, %c0_i32_0 : i32, i32
  }
  func.func @transform_2(%arg0: i32, %arg1: i32) -> (i32, i32) {
    %c0_i32 = arith.constant 0 : i32
    %c0_i32_0 = arith.constant 0 : i32
    %c0_i32_1 = arith.constant 0 : i32
    return %c0_i32, %c0_i32_0 : i32, i32
  }
  func.func @transform_3(%arg0: i32, %arg1: i32) -> (i32, i32, i32) {
    %c0_i32 = arith.constant 0 : i32
    %c0_i32_0 = arith.constant 0 : i32
    %c0_i32_1 = arith.constant 0 : i32
    return %arg1, %c0_i32, %c0_i32_0 : i32, i32, i32
  }
  func.func @transform_4(%arg0: i32, %arg1: i32) -> (i32, i32, i32) {
    %c0_i32 = arith.constant 0 : i32
    %c0_i32_0 = arith.constant 0 : i32
    %c0_i32_1 = arith.constant 0 : i32
    return %arg1, %c0_i32, %c0_i32_0 : i32, i32, i32
  }
  func.func @transform_5(%arg0: i32, %arg1: i32) -> (i32, i32, i32) {
    %c0_i32 = arith.constant 0 : i32
    %c0_i32_0 = arith.constant 0 : i32
    %c0_i32_1 = arith.constant 0 : i32
    return %arg1, %c0_i32, %c0_i32_0 : i32, i32, i32
  }
  func.func @transform_6(%arg0: i32, %arg1: i32) -> (i32, i32, i32) {
    %c0_i32 = arith.constant 0 : i32
    %c0_i32_0 = arith.constant 0 : i32
    %c0_i32_1 = arith.constant 0 : i32
    return %arg1, %c0_i32, %c0_i32_0 : i32, i32, i32
  }
  func.func @transform_7(%arg0: i32, %arg1: i32) -> (i32, i32, i32) {
    %c0_i32 = arith.constant 0 : i32
    %c0_i32_0 = arith.constant 0 : i32
    %c0_i32_1 = arith.constant 0 : i32
    return %arg1, %c0_i32, %c0_i32_0 : i32, i32, i32
  }
  func.func @transform_8(%arg0: i32, %arg1: i32) -> (i32, i32, i32) {
    %c0_i32 = arith.constant 0 : i32
    %c0_i32_0 = arith.constant 0 : i32
    %c0_i32_1 = arith.constant 0 : i32
    return %arg1, %c0_i32, %c0_i32_0 : i32, i32, i32
  }
  func.func @transform_9(%arg0: i32, %arg1: i32) -> (i32, i32, i32) {
    %c0_i32 = arith.constant 0 : i32
    %c0_i32_0 = arith.constant 0 : i32
    %c0_i32_1 = arith.constant 0 : i32
    return %arg1, %c0_i32, %c0_i32_0 : i32, i32, i32
  }
  func.func @transform_10(%arg0: i32, %arg1: i32) -> (i32, i32, i32) {
    %c0_i32 = arith.constant 0 : i32
    %c0_i32_0 = arith.constant 0 : i32
    %c0_i32_1 = arith.constant 0 : i32
    return %arg1, %c0_i32, %c0_i32_0 : i32, i32, i32
  }
  func.func @transform_11(%arg0: i32, %arg1: i32) -> (i32, i32, i32) {
    %c0_i32 = arith.constant 0 : i32
    %c0_i32_0 = arith.constant 0 : i32
    %c0_i32_1 = arith.constant 0 : i32
    return %arg1, %c0_i32, %c0_i32_0 : i32, i32, i32
  }
  func.func @transform_12(%arg0: i32, %arg1: i32) -> (i32, i32, i32) {
    %c0_i32 = arith.constant 0 : i32
    %c0_i32_0 = arith.constant 0 : i32
    %c0_i32_1 = arith.constant 0 : i32
    return %arg1, %c0_i32, %c0_i32_0 : i32, i32, i32
  }
  func.func @transform_13(%arg0: i32, %arg1: i32) -> (i32, i32, i32) {
    %c0_i32 = arith.constant 0 : i32
    %c0_i32_0 = arith.constant 0 : i32
    %c0_i32_1 = arith.constant 0 : i32
    return %arg1, %c0_i32, %c0_i32_0 : i32, i32, i32
  }
  func.func @transform_14(%arg0: i32, %arg1: i32) -> (i32, i32, i32) {
    %c0_i32 = arith.constant 0 : i32
    %c0_i32_0 = arith.constant 0 : i32
    %c0_i32_1 = arith.constant 0 : i32
    return %arg1, %c0_i32, %c0_i32_0 : i32, i32, i32
  }
  func.func @transform_15(%arg0: i32, %arg1: i32) -> (i32, i32, i32) {
    %c0_i32 = arith.constant 0 : i32
    %c0_i32_0 = arith.constant 0 : i32
    %c0_i32_1 = arith.constant 0 : i32
    return %arg1, %c0_i32, %c0_i32_0 : i32, i32, i32
  }
  func.func @transform_16(%arg0: i32, %arg1: i32) -> (i32, i32, i32) {
    %c0_i32 = arith.constant 0 : i32
    %c0_i32_0 = arith.constant 0 : i32
    %c0_i32_1 = arith.constant 0 : i32
    return %arg1, %c0_i32, %c0_i32_0 : i32, i32, i32
  }
  func.func @transform_17(%arg0: i32, %arg1: i32) -> (i32, i32, i32) {
    %c0_i32 = arith.constant 0 : i32
    %c0_i32_0 = arith.constant 0 : i32
    %c0_i32_1 = arith.constant 0 : i32
    return %arg1, %c0_i32, %c0_i32_0 : i32, i32, i32
  }
  func.func @transform_18(%arg0: i32, %arg1: i32) -> (i32, i32, i32) {
    %c0_i32 = arith.constant 0 : i32
    %c0_i32_0 = arith.constant 0 : i32
    %c0_i32_1 = arith.constant 0 : i32
    return %arg1, %c0_i32, %c0_i32_0 : i32, i32, i32
  }
  func.func @transform_19(%arg0: i32, %arg1: i32) -> (i32, i32) {
    %c0_i32 = arith.constant 0 : i32
    %c0_i32_0 = arith.constant 0 : i32
    %c0_i32_1 = arith.constant 0 : i32
    return %c0_i32, %c0_i32_0 : i32, i32
  }
  func.func @transform_20(%arg0: i32, %arg1: i32) -> (i32, i32) {
    %c0_i32 = arith.constant 0 : i32
    %c0_i32_0 = arith.constant 0 : i32
    %c0_i32_1 = arith.constant 0 : i32
    return %c0_i32, %c0_i32_0 : i32, i32
  }
  func.func @transform_21(%arg0: i32, %arg1: i32) -> (i32, i32, i32) {
    %c0_i32 = arith.constant 0 : i32
    %c0_i32_0 = arith.constant 0 : i32
    %c0_i32_1 = arith.constant 0 : i32
    return %c0_i32, %arg0, %c0_i32_0 : i32, i32, i32
  }
}

</mosaic_0001>

<bundles_post_ra>
// kernel: transformer_forward.1
= control target key start
LH: loop header
LB: loop body
LE: loop exit
PB: predicated region body
PF: predicated region fallthrough
CT: control target
= control target key end

     0   :  { %s5703_s0 = inlined_call_operand.vmem [shape: f32[8,2,8], index: 0, kind: input, shape index: {}]   ;;  %s5704_s1 = inlined_call_operand.vmem [shape: f32[8,64], index: 1, kind: input, shape index: {}]   ;;  %s5705_s2 = inlined_call_operand.vmem [shape: f32[1,64], index: 2, kind: input, shape index: {}]   ;;  %s5706_s3 = inlined_call_operand.vmem [shape: f32[2,64,64], index: 3, kind: input, shape index: {}]   ;;  %s5707_s4 = inlined_call_operand.vmem [shape: f32[2,1,64], index: 4, kind: input, shape index: {}]   ;;  %s5708_s5 = inlined_call_operand.vmem [shape: f32[2,64,64], index: 5, kind: input, shape index: {}]   ;;  %s5709_s6 = inlined_call_operand.vmem [shape: f32[2,1,64], index: 6, kind: input, shape index: {}]   ;;  %s5710_s7 = inlined_call_operand.vmem [shape: f32[2,64,64], index: 7, kind: input, shape index: {}]   ;;  %s5711_s8 = inlined_call_operand.vmem [shape: f32[2,1,64], index: 8, kind: input, shape index: {}]   ;;  %s5712_s9 = inlined_call_operand.hbm [shape: f32[2,64,64], index: 9, kind: input, shape index: {}]   ;;  %s5713_s10 = inlined_call_operand.vmem [shape: f32[2,1,64], index: 10, kind: input, shape index: {}]   ;;  %s5714_s11 = inlined_call_operand.hbm [shape: f32[2,64,128], index: 11, kind: input, shape index: {}]   ;;  %s5715_s12 = inlined_call_operand.vmem [shape: f32[2,1,128], index: 12, kind: input, shape index: {}]   ;;  %s5716_s13 = inlined_call_operand.vmem [shape: f32[2,128,64], index: 13, kind: input, shape index: {}]   ;;  %s5717_s14 = inlined_call_operand.vmem [shape: f32[2,1,64], index: 14, kind: input, shape index: {}]   ;;  %s5718_s15 = inlined_call_operand.vmem [shape: f32[2,1,64], index: 15, kind: input, shape index: {}]   ;;  %s5719_s16 = inlined_call_operand.vmem [shape: f32[2,1,64], index: 16, kind: input, shape index: {}]   ;;  %s5720_s17 = inlined_call_operand.vmem [shape: f32[2,1,64], index: 17, kind: input, shape index: {}]   ;;  %s5721_s18 = inlined_call_operand.vmem [shape: f32[2,1,64], index: 18, kind: input, shape index: {}]   ;;  %s5722_s19 = inlined_call_operand.vmem [shape: f32[64,8], index: 19, kind: input, shape index: {}]   ;;  %s5723_s20 = inlined_call_operand.vmem [shape: f32[1,8], index: 20, kind: input, shape index: {}]   ;;  %s5724_s21 = inlined_call_operand.hbm [shape: f32[8,2,8], index: 21, kind: output, shape index: {}]  }
   0x1   :  { %5735 = sst [smem:[#allocation19_spill]] %s5703_s0 }
   0x2   :  { %5736 = sst [smem:[#allocation20_spill]] %s5704_s1 }
   0x3   :  { %5737 = sst [smem:[#allocation21_spill]] %s5705_s2 }
   0x4   :  { %5738 = sst [smem:[#allocation22_spill]] %s5706_s3 }
   0x5   :  { %5739 = sst [smem:[#allocation23_spill]] %s5707_s4 }
   0x6   :  { %5740 = sst [smem:[#allocation24_spill]] %s5708_s5 }
   0x7   :  { %5741 = sst [smem:[#allocation25_spill]] %s5710_s7 }
   0x8   :  { %5742 = sst [smem:[#allocation26_spill]] %s5712_s9 }
   0x9   :  { %5743 = sst [smem:[#allocation27_spill]] %s5714_s11 }
   0xa   :  { %5744 = sst [smem:[#allocation28_spill]] %s5715_s12 }
   0xb   :  { %5745 = sst [smem:[#allocation29_spill]] %s5719_s16 }
   0xc   :  { %5746 = sst [smem:[#allocation30_spill]] %s5720_s17 }
   0xd   :  { %5747 = sst [smem:[#allocation31_spill]] %s5721_s18 }
   0xe   :  { %5748 = sst [smem:[#allocation32_spill]] %s5722_s19 }
   0xf   :  { %5749 = sst [smem:[#allocation33_spill]] %s5723_s20 }
  0x10   :  { %5750 = sst [smem:[#allocation34_spill]] %s5724_s21 }
  0x11   :  { %26 = vsyncpa [#allocation4], 0 }
  0x12   :  { %28 = vsyncpa [#allocation4 + $0x1], 0 }
  0x13   :  { %29 = vsyncpa [#allocation7], 0 }
  0x14   :  { %31 = vsyncpa [#allocation7 + $0x1], 0 }
  0x15   :  { %32 = vsyncpa [#allocation5], 0  ;;  %s5032_s2 = smov 0   ;;  %s5034_s25 = smov 0  }
  0x16   :  { %s5036_s26 = smov 0   ;;  %s5038_s27 = smov 0  }
  0x17   :  { %s5040_s3 = smov 0   ;;  %s5042_s28 = smov 0  }
  0x18 LB: > { %5751 = sst [smem:[#allocation12_spill]] %s4889_s25  ;;  %s5727_s29 = sadd.s32 4294967295, %s4905_s28   ;;  %s4905_s28 = sphi %s5042_s28, %s38_s28   ;;  %s4901_s3 = sphi %s5040_s3, %s5799_s3   ;;  %s4897_s27 = sphi %s5038_s27, %s5798_s27   ;;  %s4893_s26 = sphi %s5036_s26, %s5797_s26   ;;  %s4889_s25 = sphi %s5034_s25, %s5796_s25   ;;  %s4885_s2 = sphi %s5032_s2, %s5795_s2  }
  0x19   : > { %5752 = sst [smem:[#allocation13_spill]] %s4893_s26  ;;  %s47_s0 = sadd.s32 1, %s4901_s3 }
  0x1a   : > { %5753 = sst [smem:[#allocation14_spill]] %s4901_s3  ;;  %p48_p0 = scmp.ge.s32.totalorder %s47_s0, 2 }
  0x1b   : > { %5754 = sst [smem:[#allocation15_spill]] %s4905_s28  ;;  %s281_s4 = sadd.s32 1, %s4893_s26 }
  0x1c   : > { %p288_p1 = scmp.ne.s32.totalorder %s4893_s26, %s4889_s25  ;;  %p289_p2 = scmp.eq.s32.totalorder %s4905_s28, 0 }
  0x1d   : > { %s5801_s0 = smov (%p48_p0, %s47_s0), 0  ;;  %p294_p4 = scmp.ne.s32.totalorder %s4889_s25, %s4885_s2 }
  0x1e   : > { %5755 = sst [smem:[#allocation16_spill]] %s5801_s0  ;;  %p5068_p3 = por %p289_p2, %p288_p1 }
  0x1f   : > { %s278_s5 = ssub.s32 %s4901_s3, %s5801_s0  ;;  %p295_p5 = scmp.eq.s32.totalorder %s5727_s29, 0 }
  0x20   : > { %p279_p6 = scmp.eq.s32.totalorder %s278_s5, 0  ;;  %p4663_p8 = scmp.lt.s32.totalorder %s4905_s28, 2 }
  0x21   : > { %p5077_p7 = por %p295_p5, %p294_p4  ;;  %s5086_s1 = sand.u32 1, %s4893_s26  }
  0x22   : > { %s5083_s23 = scalar_select %p279_p6, %s4893_s26, %s281_s4  }
  0x23   : > { %s5729_s24 = sshll.u32 %s4901_s3, 10  ;;  %s4158_s21 = sshll.u32 %s5086_s1, 6 }
  0x24   : > { %5758 = sst [smem:[#allocation17_spill]] %s5083_s23  ;;  %s685_s29 = scalar_lea.vmem [#allocation3], %s4158_s21 }
  0x25   : > { %s5759_s9 = sld [smem:[#allocation26_spill]]  ;;  %s692_s5 = sshll.u32 %s685_s29, 4  ;;  %s693_s5 = int_to_ptr.vmem [resolvable:$true] %s692_s5 }
  0x26   : > { %p5097_p9 = pnand %p4663_p8, %p5068_p3  ;;  %s682_s4 = scalar_lea.sflag [#allocation4], %s5086_s1 }
  0x27   : > { %s4780_s23 = scalar_lea.vmem %s693_s5, 1024  ;;  %s4907_s20 = smov [#allocation3]  }
  0x28   : > { %p4769_p10 = pneg %p5097_p9  ;;  %p4781_p11 = scmp.ne.s32.totalorder %s693_s5, %s4780_s23 }
  0x29   : > { %s4785_s2 = sshll.u32 %s4907_s20, 4  ;;  %s4786_s2 = int_to_ptr.vmem [resolvable:$false] %s4785_s2 }
  0x2a   : > { %p4783_p12 = pnand %p4781_p11, %p4769_p10  ;;  %s4787_s29 = scalar_lea.vmem %s4786_s2, 2048 }
  0x2b   : > { %s691_s0 = scalar_lea.hbm %s5759_s9, %s5729_s24  ;;  %p4788_p0 = scmp.lt.s32.totalorder %s693_s5, %s4786_s2 }
  0x2c   : > { %p4784_p13 = pneg %p4783_p12  ;;  %p4789_p1 = scmp.lt.s32.totalorder %s4787_s29, %s4780_s23 }
  0x2e   : > { %p4790_p2 = por %p4789_p1, %p4788_p0 }
  0x30   : > { %p4791_p3 = pnand %p4790_p2, %p4784_p13 }
  0x32   : > { %4794 = shalt.err (!%p4791_p3)
}
  0x33   : > { %s4908_s30 = smov 128   ;;  %s4909_s24 = smov 8  }
  0x34   : > { %4659 = dma.hbm_to_vmem [thread:$0]  (!%p5097_p9), %s691_s0, 1024, %s693_s5, %s682_s4, %s4908_s30, %s4908_s30, %s4909_s24  }
  0x35   : > { %p4164_p4 = scmp.ge.s32.totalorder %s4905_s28, 1  ;;  %p771_p5 = scmp.lt.s32.totalorder %s4905_s28, 3 }
  0x36   : > { %s5762_s23 = sshll.u32 %s4901_s3, 10  ;;  %s5763_s11 = sld [smem:[#allocation27_spill]] }
  0x37   : > { %p5111_p6 = pnand %p4164_p4, %p771_p5  ;;  %s712_s26 = scalar_lea.vmem [#allocation6], %s4158_s21 }
  0x38   : > { %s719_s18 = sshll.u32 %s712_s26, 4  ;;  %s709_s17 = scalar_lea.sflag [#allocation7], %s5086_s1  ;;  %s720_s18 = int_to_ptr.vmem [resolvable:$true] %s719_s18 }
  0x39   : > { %s4808_s16 = scalar_lea.vmem %s720_s18, 1024  ;;  %s4910_s0 = smov [#allocation6]  }
  0x3a   : > { %p4809_p8 = scmp.ne.s32.totalorder %s720_s18, %s4808_s16  ;;  %s4813_s5 = sshll.u32 %s4910_s0, 4  ;;  %s4814_s5 = int_to_ptr.vmem [resolvable:$false] %s4813_s5 }
  0x3b   : > { %s4815_s4 = scalar_lea.vmem %s4814_s5, 2048  ;;  %p4816_p13 = scmp.lt.s32.totalorder %s720_s18, %s4814_s5 }
  0x3c   : > { %s718_s9 = scalar_lea.hbm %s5763_s11, %s5762_s23  ;;  %p4811_p11 = pnand %p4809_p8, %p4769_p10 }
  0x3d   : > { %p4817_p0 = scmp.lt.s32.totalorder %s4815_s4, %s4808_s16 }
  0x3e   : > { %p4812_p12 = pneg %p4811_p11 }
  0x3f   : > { %p4818_p1 = por %p4817_p0, %p4816_p13 }
  0x41   : > { %p4819_p2 = pnand %p4818_p1, %p4812_p12 }
  0x43   : > { %4822 = shalt.err (!%p4819_p2)
}
  0x44   : > { %4662 = dma.hbm_to_vmem [thread:$0]  (!%p5097_p9), %s718_s9, 1024, %s720_s18, %s709_s17, %s4908_s30, %s4908_s30, %s4909_s24  }
  0x45   : > { %775 = sbr.rel (%p5111_p6) target bundleno = 5756 (0x167c), region = 104 }
  0x4a   : > { %s777_s21 = sand.u32 1, %s4889_s25  }
  0x4b   : > { %s4165_s26 = sshll.u32 %s777_s21, 6  ;;  %s778_s1 = scalar_lea.sflag [#allocation4], %s777_s21 }
  0x4c   : > { %s5129_s23 = scalar_lea.vmem [#allocation3], %s4165_s26 }
  0x4d   : > { %4872 = dma.done.wait (%p5077_p7), %s778_s1, 1024  }
  0x4e   : > { %4874 = vsyncadd (%p5077_p7), %s778_s1, 4294966272  ;;  %s787_s16 = scalar_lea.sflag [#allocation7], %s777_s21  ;;  %s5135_s2 = scalar_lea.vmem [#allocation6], %s4165_s26 }
  0x4f   : > { %5764 = sst [smem:[#allocation18_spill]] %s5135_s2 }
  0x50   : > { %4876 = dma.done.wait (%p5077_p7), %s787_s16, 1024  }
  0x51   : > { %4878 = vsyncadd (%p5077_p7), %s787_s16, 4294966272  ;;  %p907_p9 = scmp.lt.s32.totalorder %s4897_s27, 1  ;;  %s5766_s29 = sld [smem:[#allocation22_spill]] }
  0x52   : > { %s5767_s21 = sld [smem:[#allocation24_spill]]  ;;  %p4175_p7 = scmp.ne.s32.totalorder %s4897_s27, 0 }
  0x53   : > { %s5143_s9 = scalar_select %p907_p9, %s4897_s27, 1 }
  0x54   : > { %s5768_s7 = sld [smem:[#allocation25_spill]] }
  0x55   : > { %s4240_s17 = sshll.u32 %s5143_s9, 6  ;;  %s4243_s24 = sshll.u32 %s5143_s9, 7 }
  0x56   : > { %s5185_s11 = scalar_lea.vmem %s5716_s13, %s4243_s24  ;;  %s947_s22 = scalar_lea.vmem %s5718_s15, %s5143_s9 }
  0x57   : > { %s5153_s0 = scalar_lea.vmem %s5766_s29, %s4240_s17  ;;  %s5770_s29 = sld [smem:[#allocation29_spill]] }
  0x58   : > { %s5158_s26 = scalar_lea.vmem %s5767_s21, %s4240_s17  ;;  %s5771_s21 = sld [smem:[#allocation30_spill]] }
  0x59   : > { %s5772_s24 = sld [smem:[#allocation31_spill]] }
  0x5a   : > { %s5167_s28 = scalar_lea.vmem %s5768_s7, %s4240_s17  ;;  %s5773_s17 = sld [smem:[#allocation20_spill]] (!%p4175_p7) }
  0x5b   : > { %960 = sbr.rel (%p4175_p7) target bundleno = 307 (0x133), region = 116  ;;  %s5774_s19 = sld [smem:[#allocation19_spill]] (!%p4175_p7) }
  0x5c   : > { %s5775_s20 = sld [smem:[#allocation21_spill]] (!%p4175_p7) }
  0x5d   : > { %s950_s7 = scalar_lea.vmem %s5770_s29, %s5143_s9 }
  0x5e   : > { %s953_s12 = scalar_lea.vmem %s5771_s21, %s5143_s9 }
  0x5f   : > { %s956_s16 = scalar_lea.vmem %s5772_s24, %s5143_s9 }
  0x60   : > { %v969_v0 = vld [vmem:[%s5773_s17] sm:$0xff]  ;;  %vm986_vm0 = vcmask 1041409   ;;  %v4911_v1 = vmov 0.0   ;;  %vm4912_vm1 = vmmov 0   ;;  %vm989_vm2 = vcmask 1042434  }
  0x61   : > { %4372 = vmatprep.subr.mxu0 %v4911_v1  ;;  %4377 = vmatprep.subr.mxu1 %v4911_v1  ;;  %v962_v2 = vld [vmem:[%s5774_s19 + $0x2] sm:$0x3]  ;;  %v963_v3 = vld [vmem:[%s5774_s19 + $0x4] sm:$0x3]  ;;  %v964_v4 = vld [vmem:[%s5774_s19 + $0x6] sm:$0x3] }
  0x62   : > { %4373 = vmatpush3.msra.mxu0 %v969_v0  ;;  %4374 = vmatprep.mubr.msk.f32.mxu0 %vm4912_vm1, %v4911_v1  ;;  %v965_v5 = vld [vmem:[%s5774_s19 + $0x8] sm:$0x3]  ;;  %v966_v6 = vld [vmem:[%s5774_s19 + $0xa] sm:$0x3]  ;;  %v967_v7 = vld [vmem:[%s5774_s19 + $0xc] sm:$0x3] }
  0x63   : > { %4378 = vmatpush3.msra.mxu1 %v969_v0  ;;  %4379 = vmatprep.mubr.msk.f32.mxu1 %vm4912_vm1, %v4911_v1  ;;  %v968_v8 = vld [vmem:[%s5774_s19 + $0xe] sm:$0x3]  ;;  %v985_v9 = vrot.slane %v962_v2, 7  ;;  %v988_v10 = vrot.slane %v963_v3, 6  ;;  %v991_v11 = vrot.slane %v964_v4, 5  ;;  %vm992_vm3 = vcmask 1043459  }
  0x64   : > { %v961_v12 = vld [vmem:[%s5774_s19] sm:$0x3]  ;;  %v994_v13 = vrot.slane %v965_v5, 4  ;;  %vm995_vm4 = vcmask 1044484   ;;  %v997_v15 = vrot.slane %v966_v6, 3  ;;  %vm998_vm5 = vcmask 1045509  }
  0x65   : > { %v987_v14 = vsel %vm986_vm0, %v985_v9, %v961_v12  ;;  %v1000_v17 = vrot.slane %v967_v7, 2  ;;  %vm1001_vm6 = vcmask 1046534   ;;  %v1003_v18 = vrot.slane %v968_v8, 1  ;;  %v4176_v38 = vld [vmem:[%s5775_s20] ss:$0 sm:$0xff] }
  0x66   : > { %v990_v16 = vsel %vm989_vm2, %v988_v10, %v987_v14  ;;  %v1089_v20 = vrot.slane %v961_v12, 1  ;;  %v1091_v21 = vrot.slane %v963_v3, 7  ;;  %v1093_v22 = vrot.slane %v964_v4, 6 }
  0x67   : > { %v993_v19 = vsel %vm992_vm3, %v991_v11, %v990_v16  ;;  %vm1004_vm7 = vcmask 1047559   ;;  %v1095_v24 = vrot.slane %v965_v5, 5  ;;  %vm1006_vm8 = vcmask 64512  }
  0x68   : > { %v996_v23 = vsel %vm995_vm4, %v994_v13, %v993_v19  ;;  %v1090_v26 = vsel %vm986_vm0, %v962_v2, %v1089_v20  ;;  %v1097_v27 = vrot.slane %v966_v6, 4  ;;  %v1099_v30 = vrot.slane %v967_v7, 3 }
  0x69   : > { %v999_v25 = vsel %vm998_vm5, %v997_v15, %v996_v23  ;;  %v1092_v29 = vsel %vm989_vm2, %v1091_v21, %v1090_v26  ;;  %v1101_v33 = vrot.slane %v968_v8, 2  ;;  %vm1079_vm9 = vcmask 523264  }
  0x6a   : > { %v1002_v28 = vsel %vm1001_vm6, %v1000_v17, %v999_v25  ;;  %v1094_v32 = vsel %vm992_vm3, %v1093_v22, %v1092_v29 }
  0x6b   : > { %v1005_v31 = vsel %vm1004_vm7, %v1003_v18, %v1002_v28  ;;  %v1096_v34 = vsel %vm995_vm4, %v1095_v24, %v1094_v32 }
  0x6c   : > { %4375 = vmatmul.mubr.msk.f32.vlgmr.msra.gmra.mxu0 %vm1006_vm8, %v1005_v31  ;;  %v1098_v35 = vsel %vm998_vm5, %v1097_v27, %v1096_v34 }
  0x6d   : > { %v1100_v36 = vsel %vm1001_vm6, %v1099_v30, %v1098_v35 }
  0x6e   : > { %v1102_v37 = vsel %vm1004_vm7, %v1101_v33, %v1100_v36 }
  0x6f   : > { %4380 = vmatmul.mubr.msk.f32.vlgmr.msra.gmra.mxu1 %vm1006_vm8, %v1102_v37 }
 0x12c   : > { %v1075_v39 = vpop.f32.mrf.mxu0 }
 0x12d   : > { %v1076_v40 = vadd.f32 %v4176_v38, %v1075_v39 }
 0x12e   : > { %v4376_v41 = vpop.f32.mrf.mxu0 }
 0x12f   : > { %1080 = vst.msk [vmem:[#allocation2] sm:$0xff] %vm1079_vm9, %v1076_v40  ;;  %v1171_v42 = vpop.f32.mrf.mxu1 }
 0x130   : > { %v1172_v43 = vadd.f32 %v4176_v38, %v1171_v42 }
 0x131   : > { %v4381_v44 = vpop.f32.mrf.mxu1 }
 0x132   : > { %1175 = vst.msk [vmem:[#allocation2 + $0x8] sm:$0xff] %vm1079_vm9, %v1172_v43 }
 0x133 PF: > { %v1282_v45 = vld [vmem:[%s5158_s26 + $0x38] sm:$0xff]  ;;  %v1281_v47 = vld [vmem:[%s5158_s26 + $0x30] sm:$0xff]  ;;  %v1280_v49 = vld [vmem:[%s5158_s26 + $0x28] sm:$0xff]  ;;  %vm1193_vm10 = vcmask 523264   ;;  %v4913_v7 = vmov 0.0   ;;  %vm4914_vm11 = vmmov 0   ;;  %s5779_s29 = scalar_lea.vmem %s5711_s8, %s5143_s9  ;;  %s5780_s2 = scalar_lea.vmem %s5713_s10, %s5143_s9 }
 0x134   : > { %v1185_v46 = vld [vmem:[%s5153_s0 + $0x38] sm:$0xff]  ;;  %4401 = vmatprep.subr.mxu1 %v1282_v45  ;;  %v1184_v48 = vld [vmem:[%s5153_s0 + $0x30] sm:$0xff]  ;;  %v1183_v50 = vld [vmem:[%s5153_s0 + $0x28] sm:$0xff]  ;;  %s5777_s4 = sld [smem:[#allocation23_spill]]  ;;  %vm1463_vm12 = vcmask 130048   ;;  %s4915_s24 = smov 112  }
 0x135   : > { %4382 = vmatprep.subr.mxu0 %v1185_v46  ;;  %4402 = vmatpush3.msra.mxu1 %v1282_v45  ;;  %v1279_v51 = vld [vmem:[%s5158_s26 + $0x20] sm:$0xff]  ;;  %v1278_v53 = vld [vmem:[%s5158_s26 + $0x18] sm:$0xff]  ;;  %v1277_v55 = vld [vmem:[%s5158_s26 + $0x10] sm:$0xff]  ;;  %vm1541_vm13 = vcmask 64512   ;;  %s4916_s18 = smov 96   ;;  %s4917_s21 = smov 80  }
 0x136   : > { %4383 = vmatpush3.msra.mxu0 %v1185_v46  ;;  %4403 = vmatprep.subr.mxu1 %v1281_v47  ;;  %v1182_v52 = vld [vmem:[%s5153_s0 + $0x20] sm:$0xff]  ;;  %v1181_v54 = vld [vmem:[%s5153_s0 + $0x18] sm:$0xff]  ;;  %v1180_v56 = vld [vmem:[%s5153_s0 + $0x10] sm:$0xff]  ;;  %s5781_s20 = sld [smem:[#allocation18_spill]]  ;;  %p4230_p10 = scmp.ne.s32.totalorder %s4897_s27, 1 }
 0x137   : > { %4384 = vmatprep.subr.mxu0 %v1184_v48  ;;  %4404 = vmatpush3.msra.mxu1 %v1281_v47  ;;  %v1276_v57 = vld [vmem:[%s5158_s26 + $0x8] sm:$0xff]  ;;  %v1275_v59 = vld [vmem:[%s5158_s26] sm:$0xff]  ;;  %v1372_v63 = vld [vmem:[%s5167_s28 + $0x38] sm:$0xff] }
 0x138   : > { %4385 = vmatpush3.msra.mxu0 %v1184_v48  ;;  %4405 = vmatprep.subr.mxu1 %v1280_v49  ;;  %v1179_v58 = vld [vmem:[%s5153_s0 + $0x8] sm:$0xff]  ;;  %v5267_v60 = vld [vmem:[#allocation2] sm:$0xff]  ;;  %v1371_v0 = vld [vmem:[%s5167_s28 + $0x30] sm:$0xff] }
 0x139   : > { %4386 = vmatprep.subr.mxu0 %v1183_v50  ;;  %4406 = vmatpush3.msra.mxu1 %v1280_v49  ;;  %v1178_v61 = vld [vmem:[%s5153_s0] sm:$0xff]  ;;  %v5270_v62 = vld [vmem:[#allocation2 + $0x8] sm:$0xff]  ;;  %v1368_v3 = vld [vmem:[%s5167_s28 + $0x18] sm:$0xff] }
 0x13a   : > { %4387 = vmatpush3.msra.mxu0 %v1183_v50  ;;  %4407 = vmatprep.subr.mxu1 %v1279_v51  ;;  %v1370_v1 = vld [vmem:[%s5167_s28 + $0x28] sm:$0xff]  ;;  %v1369_v2 = vld [vmem:[%s5167_s28 + $0x20] sm:$0xff]  ;;  %v1367_v4 = vld [vmem:[%s5167_s28 + $0x10] sm:$0xff]  ;;  %s5778_s1 = scalar_lea.vmem %s5777_s4, %s5143_s9  ;;  %s5783_s4 = sld [smem:[#allocation28_spill]] }
 0x13b   : > { %4388 = vmatprep.subr.mxu0 %v1182_v52  ;;  %4408 = vmatpush3.msra.mxu1 %v1279_v51  ;;  %v1366_v5 = vld [vmem:[%s5167_s28 + $0x8] sm:$0xff]  ;;  %v1365_v6 = vld [vmem:[%s5167_s28] sm:$0xff]  ;;  %s5776_s28 = scalar_lea.vmem %s5709_s6, %s5143_s9  ;;  %v5360_v47 = vld [vmem:[%s5129_s23 + $0x8] sm:$0xff] }
 0x13c   : > { %4389 = vmatpush3.msra.mxu0 %v1182_v52  ;;  %4409 = vmatprep.subr.mxu1 %v1278_v53  ;;  %v4183_v8 = vld [vmem:[%s5776_s28] ss:$0 sm:$0xff]  ;;  %v5363_v48 = vld [vmem:[%s5129_s23] sm:$0xff]  ;;  %v5370_v52 = vld [vmem:[%s5129_s23 + $0x18] sm:$0xff] }
 0x13d   : > { %4390 = vmatprep.subr.mxu0 %v1181_v54  ;;  %4410 = vmatpush3.msra.mxu1 %v1278_v53  ;;  %v4180_v10 = vld [vmem:[%s5778_s1] ss:$0 sm:$0xff] }
 0x13e   : > { %4391 = vmatpush3.msra.mxu0 %v1181_v54  ;;  %4411 = vmatprep.subr.mxu1 %v1277_v55  ;;  %v4186_v18 = vld [vmem:[%s5779_s29] ss:$0 sm:$0xff]  ;;  %s5789_s29 = sld [smem:[#allocation33_spill]] (!%p4230_p10) }
 0x13f   : > { %4392 = vmatprep.subr.mxu0 %v1180_v56  ;;  %4412 = vmatpush3.msra.mxu1 %v1277_v55  ;;  %v5374_v53 = vld [vmem:[%s5129_s23 + $0x10] sm:$0xff] }
 0x140   : > { %4393 = vmatpush3.msra.mxu0 %v1180_v56  ;;  %4413 = vmatprep.subr.mxu1 %v1276_v57  ;;  %s5784_s1 = scalar_lea.vmem %s5783_s4, %s5143_s9 }
 0x141   : > { %4394 = vmatprep.subr.mxu0 %v1179_v58  ;;  %4414 = vmatpush3.msra.mxu1 %v1276_v57 }
 0x142   : > { %4395 = vmatpush3.msra.mxu0 %v1179_v58  ;;  %4415 = vmatprep.subr.mxu1 %v1275_v59 }
 0x143   : > { %4417 = vmatprep.mubr.msk.f32.mxu1 %vm1193_vm10, %v5267_v60  ;;  %4416 = vmatpush3.msra.mxu1 %v1275_v59 }
 0x144   : > { %4396 = vmatprep.subr.mxu0 %v1178_v61  ;;  %4418 = vmatmul.mubr.msk.f32.vlgmr.msra.gmra.mxu1 %vm1193_vm10, %v5270_v62 }
 0x145   : > { %4397 = vmatpush3.msra.mxu0 %v1178_v61  ;;  %4398 = vmatprep.mubr.msk.f32.mxu0 %vm1193_vm10, %v5267_v60 }
 0x146   : > { %4420 = vmatprep.subr.mxu0 %v1372_v63  ;;  %4399 = vmatmul.mubr.msk.f32.vlgmr.msra.gmra.mxu0 %vm1193_vm10, %v5270_v62 }
 0x147   : > { %4421 = vmatpush3.msra.mxu0 %v1372_v63  ;;  %4436 = vmatprep.mubr.msk.f32.mxu0 %vm1193_vm10, %v5267_v60 }
 0x148   : > { %4422 = vmatprep.subr.mxu0 %v1371_v0  ;;  %4449 = vmatprep.subr.mxu1 %v4913_v7 }
 0x149   : > { %4423 = vmatpush3.msra.mxu0 %v1371_v0  ;;  %4451 = vmatprep.mubr.msk.f32.mxu1 %vm4914_vm11, %v4913_v7 }
 0x14a   : > { %4424 = vmatprep.subr.mxu0 %v1370_v1 }
 0x14b   : > { %4425 = vmatpush3.msra.mxu0 %v1370_v1 }
 0x14c   : > { %4426 = vmatprep.subr.mxu0 %v1369_v2 }
 0x14d   : > { %4427 = vmatpush3.msra.mxu0 %v1369_v2 }
 0x14e   : > { %4428 = vmatprep.subr.mxu0 %v1368_v3 }
 0x14f   : > { %4429 = vmatpush3.msra.mxu0 %v1368_v3 }
 0x150   : > { %4430 = vmatprep.subr.mxu0 %v1367_v4 }
 0x151   : > { %4431 = vmatpush3.msra.mxu0 %v1367_v4 }
 0x152   : > { %4432 = vmatprep.subr.mxu0 %v1366_v5 }
 0x153   : > { %4433 = vmatpush3.msra.mxu0 %v1366_v5 }
 0x154   : > { %4434 = vmatprep.subr.mxu0 %v1365_v6 }
 0x155   : > { %4435 = vmatpush3.msra.mxu0 %v1365_v6 }
 0x156   : > { %4437 = vmatmul.mubr.msk.f32.vlgmr.msra.gmra.mxu0 %vm1193_vm10, %v5270_v62  ;;  %4439 = vmatprep.subr.mxu0 %v4913_v7 }
 0x157   : > { %4441 = vmatprep.mubr.msk.f32.mxu0 %vm4914_vm11, %v4913_v7 }
 0x204   : > { %v4419_v9 = vpop.f32.mrf.mxu1 }
 0x205   : > { %v5308_v11 = vadd.f32 %v4419_v9, %v4183_v8 }
 0x206   : > { %v4400_v12 = vpop.f32.mrf.mxu0  ;;  %v1356_v13 = vpop.f32.mrf.mxu1 }
 0x207   : > { %v5310_v14 = vadd.f32 %v4400_v12, %v4180_v10  ;;  %v5312_v15 = vadd.f32 %v4183_v8, %v1356_v13 }
 0x208   : > { %v1266_v16 = vpop.f32.mrf.mxu0 }
 0x209   : > { %v5314_v17 = vadd.f32 %v4180_v10, %v1266_v16  ;;  %1628 = vrot.lane.b32.xlu0 %v5312_v15, %s4915_s24  ;;  %4440 = vmatpush3.xpose.msk.msra.mxu0 %vm1463_vm12, %v5312_v15  ;;  %v5401_v16 = vld [vmem:[%s5129_s23 + $0x28] sm:$0xff] }
 0x20a   : > { %4444 = vmatprep.subr.mxu0 %v4913_v7 }
 0x20c   : > { %4442 = vmatmul.mubr.msk.f32.vlgmr.msra.gmra.mxu0 %vm1463_vm12, %v5314_v17 }
 0x20d   : > { %1626 = vrot.lane.b32.xlu0 %v5314_v17, %s4915_s24  ;;  %4446 = vmatprep.mubr.msk.f32.mxu0 %vm4914_vm11, %v4913_v7 }
 0x216   : > { %v4438_v19 = vpop.f32.mrf.mxu0 }
 0x217   : > { %v5332_v20 = vadd.f32 %v4438_v19, %v4186_v18 }
 0x218   : > { %v1446_v21 = vpop.f32.mrf.mxu0 }
 0x219   : > { %v5334_v22 = vadd.f32 %v4186_v18, %v1446_v21 }
 0x21b   : > { %1717 = vrot.lane.b32.xlu0 %v5334_v22, %s4915_s24  ;;  %4445 = vmatpush3.msra.mxu0 %v5334_v22 }
 0x21c   : > { %4459 = vmatprep.subr.mxu0 %v4913_v7 }
 0x27b   : > { %v1629_v23 = vpop.permute.xlu0 %1628 }
 0x27c   : > { %4450 = vmatpush3.xpose.msk.msra.mxu1 %vm1463_vm12, %v1629_v23  ;;  %v5414_v23 = vld [vmem:[%s5129_s23 + $0x20] sm:$0xff] }
 0x27d   : > { %4454 = vmatprep.subr.mxu1 %v4913_v7 }
 0x27f   : > { %v1627_v24 = vpop.permute.xlu0 %1626 }
 0x280   : > { %4452 = vmatmul.mubr.msk.f32.vlgmr.msra.gmra.mxu1 %vm1463_vm12, %v1627_v24 }
 0x281   : > { %4456 = vmatprep.mubr.msk.f32.mxu1 %vm4914_vm11, %v4913_v7 }
 0x28d   : > { %v1718_v38 = vpop.permute.xlu0 %1717 }
 0x28e   : > { %4455 = vmatpush3.msra.mxu1 %v1718_v38 }
 0x28f   : > { %4466 = vmatprep.subr.mxu1 %v4913_v7 }
 0x2cc   : > { %v1536_v25 = vpop.f32.mrf.mxu0 }
 0x2cd   : > { %v1540_v35 = vmul.f32 0.25, %v1536_v25 }
 0x2ce   : > { %v4443_v26 = vpop.f32.mrf.mxu0 }
 0x2cf   : > { %v1542_v37 = vsel %vm1541_vm13, %v1540_v35, -inf }
 0x340   : > { %v1700_v27 = vpop.f32.mrf.mxu1 }
 0x341   : > { %v1704_v28 = vmul.f32 0.25, %v1700_v27 }
 0x342   : > { %v4453_v29 = vpop.f32.mrf.mxu1 }
 0x343   : > { %v1705_v30 = vsel %vm1541_vm13, %v1704_v28, -inf }
 0x344   : > { %1706 = vmax.xlane.f32.xlu1 %v1705_v30 }
 0x3cd   : > { %v1707_v31 = vpop.xlane.xlu1 %1706 }
 0x3ce   : > { %v1708_v32 = vsub.f32 %v1704_v28, %v1707_v31 }
 0x3d0   : > { %v1709_v33 = vmul.f32 1.442695, %v1708_v32 }
 0x3d2   : > { %4727 = vpow2.f32 %v1709_v33 }
 0x3df   : > { %v4728_v34 = vpop.eup %4727 }
 0x3e0   : > { %v1711_v36 = vsel %vm1541_vm13, %v4728_v34, 0.0 }
 0x3e1   : > { %1712 = vadd.xlane.f32.xlu1 %v1711_v36 }
 0x3e5   : > { %1543 = vmax.xlane.f32.xlu1 %v1542_v37 }
 0x3f6   : > { %1941 = vrot.lane.b32.xlu1 %v5312_v15, %s4916_s18 }
 0x3fa   : > { %1939 = vrot.lane.b32.xlu1 %v5314_v17, %s4916_s18 }
 0x46a   : > { %v1713_v39 = vpop.xlane.xlu1 %1712 }
 0x46b   : > { %4729 = vrcp.f32 %v1713_v39  ;;  %v5431_v39 = vld [vmem:[%s5129_s23 + $0x38] sm:$0xff] }
 0x46e   : > { %v1544_v40 = vpop.xlane.xlu1 %1543 }
 0x46f   : > { %v1545_v41 = vsub.f32 %v1540_v35, %v1544_v40  ;;  %v5434_v40 = vld [vmem:[%s5129_s23 + $0x30] sm:$0xff] }
 0x471   : > { %v1546_v42 = vmul.f32 1.442695, %v1545_v41 }
 0x472   : > { %v1942_v54 = vpop.permute.xlu1 %1941 }
 0x473   : > { %4731 = vpow2.f32 %v1546_v42 }
 0x476   : > { %v1940_v57 = vpop.permute.xlu1 %1939 }
 0x478   : > { %v4730_v43 = vpop.eup %4729 }
 0x479   : > { %v1715_v44 = vmul.f32 %v4730_v43, %v4728_v34 }
 0x47b   : > { %4457 = vmatmul.mubr.msk.f32.vlgmr.msra.gmra.mxu1 %vm1541_vm13, %v1715_v44 }
 0x47c   : > { %4470 = vmatprep.mubr.msk.f32.mxu1 %vm4914_vm11, %v4913_v7  ;;  %4467 = vmatpush3.msra.mxu1 %v5360_v47 }
 0x47d   : > { %4468 = vmatprep.subr.mxu1 %v4913_v7 }
 0x47e   : > { %4469 = vmatpush3.msra.mxu1 %v5363_v48 }
 0x47f   : > { %4478 = vmatprep.subr.mxu1 %v4913_v7 }
 0x480   : > { %v4732_v45 = vpop.eup %4731 }
 0x481   : > { %v1548_v46 = vsel %vm1541_vm13, %v4732_v45, 0.0 }
 0x482   : > { %1549 = vadd.xlane.f32.xlu0 %v1548_v46 }
 0x498   : > { %2029 = vrot.lane.b32.xlu0 %v5334_v22, %s4916_s18 }
 0x50b   : > { %v1550_v49 = vpop.xlane.xlu0 %1549 }
 0x50c   : > { %4733 = vrcp.f32 %v1550_v49 }
 0x50f   : > { %v2030_v59 = vpop.permute.xlu0 %2029 }
 0x519   : > { %v4734_v50 = vpop.eup %4733 }
 0x51a   : > { %v1552_v51 = vmul.f32 %v4734_v50, %v4732_v45 }
 0x51c   : > { %4447 = vmatmul.mubr.msk.f32.vlgmr.msra.gmra.mxu0 %vm1541_vm13, %v1552_v51 }
 0x51d   : > { %4460 = vmatpush3.msra.mxu0 %v5370_v52  ;;  %4463 = vmatprep.mubr.msk.f32.mxu0 %vm4914_vm11, %v4913_v7 }
 0x51e   : > { %4461 = vmatprep.subr.mxu0 %v4913_v7 }
 0x51f   : > { %4462 = vmatpush3.msra.mxu0 %v5374_v53 }
 0x520   : > { %4473 = vmatprep.subr.mxu0 %v4913_v7 }
 0x53b   : > { %v1789_v55 = vpop.f32.mrf.mxu1 }
 0x53c   : > { %4464 = vmatmul.mubr.msk.f32.vlgmr.msra.gmra.mxu0 %vm1463_vm12, %v1789_v55 }
 0x53d   : > { %4474 = vmatpush3.xpose.msk.msra.mxu0 %vm1463_vm12, %v1942_v54  ;;  %v4458_v56 = vpop.f32.mrf.mxu1  ;;  %4475 = vmatprep.mubr.msk.f32.mxu0 %vm4914_vm11, %v4913_v7 }
 0x53e   : > { %4483 = vmatprep.subr.mxu0 %v4913_v7 }
 0x540   : > { %4476 = vmatmul.mubr.msk.f32.vlgmr.msra.gmra.mxu0 %vm1463_vm12, %v1940_v57 }
 0x541   : > { %4487 = vmatprep.mubr.msk.f32.mxu0 %vm4914_vm11, %v4913_v7  ;;  %4484 = vmatpush3.msra.mxu0 %v5401_v16 }
 0x542   : > { %4485 = vmatprep.subr.mxu0 %v4913_v7 }
 0x543   : > { %4486 = vmatpush3.msra.mxu0 %v5414_v23 }
 0x544   : > { %4495 = vmatprep.subr.mxu0 %v4913_v7 }
 0x5dc   : > { %v1622_v58 = vpop.f32.mrf.mxu0 }
 0x5dd   : > { %4471 = vmatmul.mubr.msk.f32.vlgmr.msra.gmra.mxu1 %vm1463_vm12, %v1622_v58 }
 0x5de   : > { %4479 = vmatpush3.msra.mxu1 %v2030_v59  ;;  %v4448_v61 = vpop.f32.mrf.mxu0  ;;  %4480 = vmatprep.mubr.msk.f32.mxu1 %vm4914_vm11, %v4913_v7 }
 0x5df   : > { %4490 = vmatprep.subr.mxu1 %v4913_v7 }
 0x5fc   : > { %v1862_v63 = vpop.f32.mrf.mxu0 }
 0x5fe   : > { %v4465_v0 = vpop.f32.mrf.mxu0 }
 0x600   : > { %v2013_v1 = vpop.f32.mrf.mxu0 }
 0x601   : > { %v2017_v2 = vmul.f32 0.25, %v2013_v1 }
 0x602   : > { %v4477_v3 = vpop.f32.mrf.mxu0 }
 0x603   : > { %v2018_v4 = vsel %vm1541_vm13, %v2017_v2, -inf }
 0x604   : > { %2019 = vmax.xlane.f32.xlu1 %v2018_v4 }
 0x615   : > { %2179 = vrot.lane.b32.xlu1 %v5314_v17, %s4917_s21 }
 0x68d   : > { %v2020_v5 = vpop.xlane.xlu1 %2019 }
 0x68e   : > { %v2021_v6 = vsub.f32 %v2017_v2, %v2020_v5 }
 0x690   : > { %v2022_v8 = vmul.f32 1.442695, %v2021_v6 }
 0x692   : > { %4735 = vpow2.f32 %v2022_v8 }
 0x69d   : > { %v1935_v9 = vpop.f32.mrf.mxu1 }
 0x69f   : > { %v4736_v10 = vpop.eup %4735  ;;  %v4472_v12 = vpop.f32.mrf.mxu1 }
 0x6a0   : > { %v2024_v13 = vsel %vm1541_vm13, %v4736_v10, 0.0 }
 0x6a1   : > { %2025 = vadd.xlane.f32.xlu0 %v2024_v13 }
 0x6b7   : > { %2181 = vrot.lane.b32.xlu0 %v5312_v15, %s4917_s21  ;;  %v2180_v15 = vpop.permute.xlu1 %2179 }
 0x72a   : > { %v2026_v17 = vpop.xlane.xlu0 %2025 }
 0x72b   : > { %4737 = vrcp.f32 %v2026_v17 }
 0x72e   : > { %v2182_v21 = vpop.permute.xlu0 %2181 }
 0x738   : > { %v4738_v18 = vpop.eup %4737 }
 0x739   : > { %v2028_v19 = vmul.f32 %v4738_v18, %v4736_v10 }
 0x73b   : > { %4481 = vmatmul.mubr.msk.f32.vlgmr.msra.gmra.mxu1 %vm1541_vm13, %v2028_v19 }
 0x73c   : > { %4491 = vmatpush3.xpose.msk.msra.mxu1 %vm1463_vm12, %v2182_v21  ;;  %4492 = vmatprep.mubr.msk.f32.mxu1 %vm4914_vm11, %v4913_v7 }
 0x73d   : > { %4500 = vmatprep.subr.mxu1 %v4913_v7 }
 0x73f   : > { %4493 = vmatmul.mubr.msk.f32.vlgmr.msra.gmra.mxu1 %vm1463_vm12, %v2180_v15 }
 0x740   : > { %4504 = vmatprep.mubr.msk.f32.mxu1 %vm4914_vm11, %v4913_v7  ;;  %4501 = vmatpush3.msra.mxu1 %v5431_v39 }
 0x741   : > { %4502 = vmatprep.subr.mxu1 %v4913_v7 }
 0x742   : > { %4503 = vmatpush3.msra.mxu1 %v5434_v40 }
 0x743   : > { %4512 = vmatprep.subr.mxu1 %v4913_v7 }
 0x7fb   : > { %v2101_v24 = vpop.f32.mrf.mxu1 }
 0x7fc   : > { %4488 = vmatmul.mubr.msk.f32.vlgmr.msra.gmra.mxu0 %vm1463_vm12, %v2101_v24 }
 0x7fd   : > { %v4482_v25 = vpop.f32.mrf.mxu1  ;;  %4497 = vmatprep.mubr.msk.f32.mxu0 %vm4914_vm11, %v4913_v7 }
 0x7ff   : > { %v2253_v26 = vpop.f32.mrf.mxu1 }
 0x800   : > { %v2257_v27 = vmul.f32 0.25, %v2253_v26 }
 0x801   : > { %v4494_v28 = vpop.f32.mrf.mxu1 }
 0x802   : > { %v2258_v29 = vsel %vm1541_vm13, %v2257_v27, -inf }
 0x803   : > { %2259 = vmax.xlane.f32.xlu0 %v2258_v29 }
 0x819   : > { %2269 = vrot.lane.b32.xlu0 %v5334_v22, %s4917_s21  ;;  %v1936_v22 = vadd.f32 %v1935_v9, %v1862_v63 }
 0x81d   : > { %2580 = vrot.lane.b32.xlu0 %v5310_v14, %s4915_s24 }
 0x88c   : > { %v2260_v30 = vpop.xlane.xlu0 %2259 }
 0x88d   : > { %v2261_v31 = vsub.f32 %v2257_v27, %v2260_v30 }
 0x88f   : > { %v2262_v32 = vmul.f32 1.442695, %v2261_v31 }
 0x890   : > { %v2270_v33 = vpop.permute.xlu0 %2269 }
 0x891   : > { %4739 = vpow2.f32 %v2262_v32  ;;  %4496 = vmatpush3.msra.mxu0 %v2270_v33 }
 0x892   : > { %4507 = vmatprep.subr.mxu0 %v4913_v7 }
 0x894   : > { %v2581_v45 = vpop.permute.xlu0 %2580 }
 0x89e   : > { %v4740_v34 = vpop.eup %4739 }
 0x89f   : > { %v2264_v35 = vsel %vm1541_vm13, %v4740_v34, 0.0 }
 0x8a0   : > { %2265 = vadd.xlane.f32.xlu1 %v2264_v35 }
 0x8b1   : > { %2582 = vrot.lane.b32.xlu1 %v5308_v11, %s4915_s24 }
 0x8bc   : > { %v2174_v36 = vpop.f32.mrf.mxu0 }
 0x8bd   : > { %v2178_v37 = vadd.f32 %v2174_v36, %v1936_v22 }
 0x8be   : > { %v4489_v38 = vpop.f32.mrf.mxu0 }
 0x929   : > { %v2266_v41 = vpop.xlane.xlu1 %2265 }
 0x92a   : > { %4741 = vrcp.f32 %v2266_v41 }
 0x92d   : > { %v2583_v44 = vpop.permute.xlu1 %2582 }
 0x937   : > { %v4742_v42 = vpop.eup %4741 }
 0x938   : > { %v2268_v43 = vmul.f32 %v4742_v42, %v4740_v34 }
 0x93a   : > { %4498 = vmatmul.mubr.msk.f32.vlgmr.msra.gmra.mxu0 %vm1541_vm13, %v2268_v43 }
 0x93b   : > { %4508 = vmatpush3.xpose.msk.msra.mxu0 %vm1463_vm12, %v5308_v11  ;;  %4509 = vmatprep.mubr.msk.f32.mxu0 %vm4914_vm11, %v4913_v7 }
 0x93c   : > { %4517 = vmatprep.subr.mxu0 %v4913_v7 }
 0x93e   : > { %4510 = vmatmul.mubr.msk.f32.vlgmr.msra.gmra.mxu0 %vm1463_vm12, %v5310_v14 }
 0x93f   : > { %4518 = vmatpush3.xpose.msk.msra.mxu0 %vm1463_vm12, %v2583_v44  ;;  %4519 = vmatprep.mubr.msk.f32.mxu0 %vm4914_vm11, %v4913_v7 }
 0x940   : > { %4527 = vmatprep.subr.mxu0 %v4913_v7 }
 0x942   : > { %4520 = vmatmul.mubr.msk.f32.vlgmr.msra.gmra.mxu0 %vm1463_vm12, %v2581_v45 }
 0x943   : > { %4528 = vmatpush3.msra.mxu0 %v5370_v52  ;;  %4531 = vmatprep.mubr.msk.f32.mxu0 %vm4914_vm11, %v4913_v7 }
 0x944   : > { %4529 = vmatprep.subr.mxu0 %v4913_v7 }
 0x945   : > { %4530 = vmatpush3.msra.mxu0 %v5374_v53 }
 0x946   : > { %4541 = vmatprep.subr.mxu0 %v4913_v7 }
 0x9fa   : > { %v2341_v46 = vpop.f32.mrf.mxu0 }
 0x9fb   : > { %4505 = vmatmul.mubr.msk.f32.vlgmr.msra.gmra.mxu1 %vm1463_vm12, %v2341_v46 }
 0x9fc   : > { %4513 = vmatpush3.msra.mxu1 %v5332_v20  ;;  %v4499_v49 = vpop.f32.mrf.mxu0  ;;  %4514 = vmatprep.mubr.msk.f32.mxu1 %vm4914_vm11, %v4913_v7 }
 0x9fd   : > { %4522 = vmatprep.subr.mxu1 %v4913_v7 }
 0x9fe   : > { %v2491_v50 = vpop.f32.mrf.mxu0 }
 0x9ff   : > { %v2495_v51 = vmul.f32 0.25, %v2491_v50 }
 0xa00   : > { %v4511_v52 = vpop.f32.mrf.mxu0 }
 0xa01   : > { %v2496_v54 = vsel %vm1541_vm13, %v2495_v51, -inf }
 0xa02   : > { %2497 = vmax.xlane.f32.xlu0 %v2496_v54  ;;  %v2654_v53 = vpop.f32.mrf.mxu0 }
 0xa03   : > { %v2658_v55 = vmul.f32 0.25, %v2654_v53 }
 0xa04   : > { %v4521_v56 = vpop.f32.mrf.mxu0 }
 0xa05   : > { %v2659_v57 = vsel %vm1541_vm13, %v2658_v55, -inf }
 0xa06   : > { %2660 = vmax.xlane.f32.xlu1 %v2659_v57 }
 0xa17   : > { %2895 = vrot.lane.b32.xlu1 %v5308_v11, %s4916_s18 }
 0xa8b   : > { %v2498_v58 = vpop.xlane.xlu0 %2497 }
 0xa8c   : > { %v2499_v59 = vsub.f32 %v2495_v51, %v2498_v58 }
 0xa8e   : > { %v2500_v61 = vmul.f32 1.442695, %v2499_v59 }
 0xa8f   : > { %v2661_v63 = vpop.xlane.xlu1 %2660 }
 0xa90   : > { %4743 = vpow2.f32 %v2500_v61  ;;  %v2662_v0 = vsub.f32 %v2658_v55, %v2661_v63 }
 0xa92   : > { %v2663_v1 = vmul.f32 1.442695, %v2662_v0 }
 0xa93   : > { %v2896_v26 = vpop.permute.xlu1 %2895 }
 0xa94   : > { %4745 = vpow2.f32 %v2663_v1 }
 0xa9d   : > { %v4744_v2 = vpop.eup %4743 }
 0xa9e   : > { %v2502_v3 = vsel %vm1541_vm13, %v4744_v2, 0.0 }
 0xa9f   : > { %2503 = vadd.xlane.f32.xlu0 %v2502_v3 }
 0xaa1   : > { %v4746_v4 = vpop.eup %4745 }
 0xaa2   : > { %v2665_v5 = vsel %vm1541_vm13, %v4746_v4, 0.0 }
 0xaa3   : > { %2666 = vadd.xlane.f32.xlu0 %v2665_v5 }
 0xab9   : > { %2671 = vrot.lane.b32.xlu0 %v5332_v20, %s4915_s24 }
 0xabb   : > { %v2414_v6 = vpop.f32.mrf.mxu1 }
 0xabc   : > { %v5472_v8 = vadd.f32 %v2414_v6, %v2178_v37 }
 0xabd   : > { %v4506_v9 = vpop.f32.mrf.mxu1  ;;  %2893 = vrot.lane.b32.xlu0 %v5310_v14, %s4916_s18 }
 0xb28   : > { %v2504_v10 = vpop.xlane.xlu0 %2503 }
 0xb29   : > { %4747 = vrcp.f32 %v2504_v10 }
 0xb2c   : > { %v2667_v12 = vpop.xlane.xlu0 %2666 }
 0xb2d   : > { %4749 = vrcp.f32 %v2667_v12 }
 0xb30   : > { %v2672_v18 = vpop.permute.xlu0 %2671 }
 0xb36   : > { %v4748_v13 = vpop.eup %4747 }
 0xb37   : > { %v2506_v17 = vmul.f32 %v4748_v13, %v4744_v2 }
 0xb39   : > { %4515 = vmatmul.mubr.msk.f32.vlgmr.msra.gmra.mxu1 %vm1541_vm13, %v2506_v17 }
 0xb3a   : > { %v4750_v19 = vpop.eup %4749  ;;  %4523 = vmatpush3.msra.mxu1 %v2672_v18  ;;  %4524 = vmatprep.mubr.msk.f32.mxu1 %vm4914_vm11, %v4913_v7 }
 0xb3b   : > { %v2669_v21 = vmul.f32 %v4750_v19, %v4746_v4  ;;  %4534 = vmatprep.subr.mxu1 %v4913_v7 }
 0xb3d   : > { %4525 = vmatmul.mubr.msk.f32.vlgmr.msra.gmra.mxu1 %vm1541_vm13, %v2669_v21 }
 0xb3e   : > { %4535 = vmatpush3.msra.mxu1 %v5360_v47  ;;  %4538 = vmatprep.mubr.msk.f32.mxu1 %vm4914_vm11, %v4913_v7 }
 0xb3f   : > { %4536 = vmatprep.subr.mxu1 %v4913_v7 }
 0xb40   : > { %4537 = vmatpush3.msra.mxu1 %v5363_v48  ;;  %v2894_v48 = vpop.permute.xlu0 %2893 }
 0xb41   : > { %4546 = vmatprep.subr.mxu1 %v4913_v7 }
 0xbf9   : > { %v2576_v15 = vpop.f32.mrf.mxu1 }
 0xbfa   : > { %4539 = vmatmul.mubr.msk.f32.vlgmr.msra.gmra.mxu1 %vm1463_vm12, %v2576_v15 }
 0xbfb   : > { %v4516_v24 = vpop.f32.mrf.mxu1  ;;  %4548 = vmatprep.mubr.msk.f32.mxu1 %vm4914_vm11, %v4913_v7 }
 0xbfd   : > { %v2743_v25 = vpop.f32.mrf.mxu1 }
 0xbfe   : > { %4532 = vmatmul.mubr.msk.f32.vlgmr.msra.gmra.mxu0 %vm1463_vm12, %v2743_v25 }
 0xbff   : > { %4542 = vmatpush3.xpose.msk.msra.mxu0 %vm1463_vm12, %v2896_v26  ;;  %v4526_v47 = vpop.f32.mrf.mxu1  ;;  %4543 = vmatprep.mubr.msk.f32.mxu0 %vm4914_vm11, %v4913_v7 }
 0xc00   : > { %4551 = vmatprep.subr.mxu0 %v4913_v7 }
 0xc02   : > { %4544 = vmatmul.mubr.msk.f32.vlgmr.msra.gmra.mxu0 %vm1463_vm12, %v2894_v48 }
 0xc03   : > { %4552 = vmatpush3.msra.mxu0 %v5401_v16  ;;  %4555 = vmatprep.mubr.msk.f32.mxu0 %vm4914_vm11, %v4913_v7 }
 0xc04   : > { %4553 = vmatprep.subr.mxu0 %v4913_v7 }
 0xc05   : > { %4554 = vmatpush3.msra.mxu0 %v5414_v23 }
 0xc06   : > { %4563 = vmatprep.subr.mxu0 %v4913_v7 }
 0xcba   : > { %v2889_v27 = vpop.f32.mrf.mxu1 }
 0xcbc   : > { %v4540_v28 = vpop.f32.mrf.mxu1 }
 0xcbe   : > { %v2816_v29 = vpop.f32.mrf.mxu0 }
 0xcbf   : > { %v2890_v30 = vadd.f32 %v2889_v27, %v2816_v29  ;;  %v5552_v27 = vld [vmem:[%s947_s22] ss:$0 sm:$0xff] }
 0xcc0   : > { %v4533_v31 = vpop.f32.mrf.mxu0  ;;  %v5559_v29 = vld [vmem:[%s950_s7] ss:$0 sm:$0xff] }
 0xcc1   : > { %v3436_v31 = vld [vmem:[%s5781_s20 + $0x38] sm:$0xff] }
 0xcc2   : > { %v2967_v32 = vpop.f32.mrf.mxu0 }
 0xcc3   : > { %v2971_v33 = vmul.f32 0.25, %v2967_v32 }
 0xcc4   : > { %v4545_v34 = vpop.f32.mrf.mxu0 }
 0xcc5   : > { %v2972_v35 = vsel %vm1541_vm13, %v2971_v33, -inf  ;;  %v3434_v34 = vld [vmem:[%s5781_s20 + $0x28] sm:$0xff] }
 0xcc6   : > { %2973 = vmax.xlane.f32.xlu1 %v2972_v35  ;;  %v3433_v35 = vld [vmem:[%s5781_s20 + $0x20] sm:$0xff] }
 0xcd7   : > { %3135 = vrot.lane.b32.xlu1 %v5308_v11, %s4917_s21 }
 0xcdb   : > { %3133 = vrot.lane.b32.xlu1 %v5310_v14, %s4917_s21 }
 0xd4f   : > { %v2974_v16 = vpop.xlane.xlu1 %2973 }
 0xd50   : > { %v2975_v23 = vsub.f32 %v2971_v33, %v2974_v16  ;;  %v3435_v33 = vld [vmem:[%s5781_s20 + $0x30] sm:$0xff]  ;;  %v3432_v16 = vld [vmem:[%s5781_s20 + $0x18] sm:$0xff] }
 0xd52   : > { %v2976_v22 = vmul.f32 1.442695, %v2975_v23  ;;  %v3431_v23 = vld [vmem:[%s5781_s20 + $0x10] sm:$0xff] }
 0xd53   : > { %v3136_v42 = vpop.permute.xlu1 %3135 }
 0xd54   : > { %4751 = vpow2.f32 %v2976_v22  ;;  %v3430_v22 = vld [vmem:[%s5781_s20 + $0x8] sm:$0xff] }
 0xd57   : > { %v3134_v43 = vpop.permute.xlu1 %3133 }
 0xd61   : > { %v4752_v36 = vpop.eup %4751 }
 0xd62   : > { %v2978_v37 = vsel %vm1541_vm13, %v4752_v36, 0.0 }
 0xd63   : > { %2979 = vadd.xlane.f32.xlu0 %v2978_v37  ;;  %v3542_v37 = vld [vmem:[%s5185_s11 + $0x78] sm:$0xff] }
 0xd79   : > { %2983 = vrot.lane.b32.xlu0 %v5332_v20, %s4916_s18 }
 0xdec   : > { %v2980_v38 = vpop.xlane.xlu0 %2979 }
 0xded   : > { %4753 = vrcp.f32 %v2980_v38  ;;  %v3541_v38 = vld [vmem:[%s5185_s11 + $0x70] sm:$0xff] }
 0xdf0   : > { %v2984_v41 = vpop.permute.xlu0 %2983 }
 0xdf1   : > { %4547 = vmatpush3.msra.mxu1 %v2984_v41  ;;  %v3540_v41 = vld [vmem:[%s5185_s11 + $0x68] sm:$0xff] }
 0xdf2   : > { %4558 = vmatprep.subr.mxu1 %v4913_v7 }
 0xdfa   : > { %v4754_v11 = vpop.eup %4753 }
 0xdfb   : > { %v2982_v14 = vmul.f32 %v4754_v11, %v4752_v36  ;;  %v3429_v36 = vld [vmem:[%s5781_s20] sm:$0xff]  ;;  %s5788_s20 = sld [smem:[#allocation32_spill]] (!%p4230_p10) }
 0xdfc   : > { %v3539_v11 = vld [vmem:[%s5185_s11 + $0x60] sm:$0xff] }
 0xdfd   : > { %4549 = vmatmul.mubr.msk.f32.vlgmr.msra.gmra.mxu1 %vm1541_vm13, %v2982_v14  ;;  %v3537_v14 = vld [vmem:[%s5185_s11 + $0x50] sm:$0xff] }
 0xdfe   : > { %4559 = vmatpush3.xpose.msk.msra.mxu1 %vm1463_vm12, %v3136_v42  ;;  %4560 = vmatprep.mubr.msk.f32.mxu1 %vm4914_vm11, %v4913_v7  ;;  %v3538_v42 = vld [vmem:[%s5185_s11 + $0x58] sm:$0xff] }
 0xdff   : > { %4568 = vmatprep.subr.mxu1 %v4913_v7 }
 0xe01   : > { %4561 = vmatmul.mubr.msk.f32.vlgmr.msra.gmra.mxu1 %vm1463_vm12, %v3134_v43  ;;  %v3536_v43 = vld [vmem:[%s5185_s11 + $0x48] sm:$0xff] }
 0xe02   : > { %4569 = vmatpush3.msra.mxu1 %v5431_v39  ;;  %4572 = vmatprep.mubr.msk.f32.mxu1 %vm4914_vm11, %v4913_v7 }
 0xe03   : > { %4570 = vmatprep.subr.mxu1 %v4913_v7 }
 0xe04   : > { %4571 = vmatpush3.msra.mxu1 %v5434_v40 }
 0xe05   : > { %4594 = vmatprep.subr.mxu1 %v3542_v37 }
 0xebd   : > { %v3055_v44 = vpop.f32.mrf.mxu1 }
 0xebe   : > { %4556 = vmatmul.mubr.msk.f32.vlgmr.msra.gmra.mxu0 %vm1463_vm12, %v3055_v44  ;;  %v3535_v44 = vld [vmem:[%s5185_s11 + $0x40] sm:$0xff] }
 0xebf   : > { %v4550_v45 = vpop.f32.mrf.mxu1  ;;  %4565 = vmatprep.mubr.msk.f32.mxu0 %vm4914_vm11, %v4913_v7  ;;  %v4221_v7 = vld [vmem:[%s5780_s2] ss:$0 sm:$0xff] }
 0xec0   : > { %v3380_v53 = vadd.f32 %v4221_v7, %v5472_v8  ;;  %v3534_v45 = vld [vmem:[%s5185_s11 + $0x38] sm:$0xff] }
 0xec1   : > { %v3207_v46 = vpop.f32.mrf.mxu1 }
 0xec2   : > { %v3211_v49 = vmul.f32 0.25, %v3207_v46  ;;  %v3382_v57 = vadd.f32 %v3380_v53, %v5267_v60  ;;  %v3533_v46 = vld [vmem:[%s5185_s11 + $0x30] sm:$0xff] }
 0xec3   : > { %v4562_v50 = vpop.f32.mrf.mxu1 }
 0xec4   : > { %v3212_v39 = vsel %vm1541_vm13, %v3211_v49, -inf  ;;  %v3531_v50 = vld [vmem:[%s5185_s11 + $0x20] sm:$0xff] }
 0xec5   : > { %3213 = vmax.xlane.f32.xlu0 %v3212_v39 }
 0xedb   : > { %3223 = vrot.lane.b32.xlu0 %v5332_v20, %s4917_s21  ;;  %v3386_v20 = vsel %vm1193_vm10, %v3382_v57, 0.0 }
 0xf4e   : > { %v3214_v51 = vpop.xlane.xlu0 %3213 }
 0xf4f   : > { %v3215_v52 = vsub.f32 %v3211_v49, %v3214_v51  ;;  %v3532_v49 = vld [vmem:[%s5185_s11 + $0x28] sm:$0xff] }
 0xf51   : > { %v3216_v40 = vmul.f32 1.442695, %v3215_v52 }
 0xf52   : > { %v3224_v54 = vpop.permute.xlu0 %3223 }
 0xf53   : > { %4755 = vpow2.f32 %v3216_v40  ;;  %4564 = vmatpush3.msra.mxu0 %v3224_v54 }
 0xf54   : > { %4575 = vmatprep.subr.mxu0 %v3436_v31 }
 0xf60   : > { %v4756_v55 = vpop.eup %4755 }
 0xf61   : > { %v3218_v56 = vsel %vm1541_vm13, %v4756_v55, 0.0 }
 0xf62   : > { %3219 = vadd.xlane.f32.xlu1 %v3218_v56  ;;  %v3529_v56 = vld [vmem:[%s5185_s11 + $0x10] sm:$0xff] }
 0xf66   : > { %3387 = vadd.xlane.f32.xlu1 %v3386_v20  ;;  %v3527_v20 = vld [vmem:[%s5185_s11] sm:$0xff] }
 0xf7e   : > { %v3128_v58 = vpop.f32.mrf.mxu0 }
 0xf7f   : > { %v3132_v59 = vadd.f32 %v3128_v58, %v2890_v30  ;;  %v4224_v58 = vld [vmem:[%s5784_s1] ss:$0 sm:$0xff] }
 0xf80   : > { %v4557_v61 = vpop.f32.mrf.mxu0 }
 0xfeb   : > { %v3220_v63 = vpop.xlane.xlu1 %3219 }
 0xfec   : > { %4757 = vrcp.f32 %v3220_v63 }
 0xfef   : > { %v3388_v4 = vpop.xlane.xlu1 %3387 }
 0xff0   : > { %v3393_v5 = vmul.f32 0.015625, %v3388_v4 }
 0xff2   : > { %v3395_v9 = vsub.f32 %v3382_v57, %v3393_v5  ;;  %v3528_v57 = vld [vmem:[%s5185_s11 + $0x8] sm:$0xff] }
 0xff4   : > { %v3397_v17 = vmul.f32 %v3395_v9, %v3395_v9 }
 0xff6   : > { %v3399_v18 = vsel %vm1193_vm10, %v3397_v17, 0.0 }
 0xff9   : > { %v4758_v0 = vpop.eup %4757 }
 0xffa   : > { %v3222_v1 = vmul.f32 %v4758_v0, %v4756_v55  ;;  %v3530_v55 = vld [vmem:[%s5185_s11 + $0x18] sm:$0xff]  ;;  %s5785_s11 = scalar_lea.vmem %s5717_s14, %s5143_s9 }
 0xffc   : > { %4566 = vmatmul.mubr.msk.f32.vlgmr.msra.gmra.mxu0 %vm1541_vm13, %v3222_v1 }
 0xffd   : > { %4576 = vmatpush3.msra.mxu0 %v3436_v31 }
 0xffe   : > { %4577 = vmatprep.subr.mxu0 %v3435_v33 }
 0xfff   : > { %4578 = vmatpush3.msra.mxu0 %v3435_v33 }
0x1000   : > { %4579 = vmatprep.subr.mxu0 %v3434_v34 }
0x1001   : > { %4580 = vmatpush3.msra.mxu0 %v3434_v34  ;;  %v4229_v34 = vld [vmem:[%s956_s16] ss:$0 sm:$0xff] }
0x1002   : > { %4581 = vmatprep.subr.mxu0 %v3433_v35 }
0x1003   : > { %4582 = vmatpush3.msra.mxu0 %v3433_v35 }
0x1004   : > { %4583 = vmatprep.subr.mxu0 %v3432_v16 }
0x1005   : > { %4584 = vmatpush3.msra.mxu0 %v3432_v16 }
0x1006   : > { %4585 = vmatprep.subr.mxu0 %v3431_v23 }
0x1007   : > { %4586 = vmatpush3.msra.mxu0 %v3431_v23 }
0x1008   : > { %4587 = vmatprep.subr.mxu0 %v3430_v22 }
0x1009   : > { %4588 = vmatpush3.msra.mxu0 %v3430_v22 }
0x100a   : > { %4589 = vmatprep.subr.mxu0 %v3429_v36 }
0x100b   : > { %4590 = vmatpush3.msra.mxu0 %v3429_v36 }
0x10bc   : > { %v3295_v2 = vpop.f32.mrf.mxu0 }
0x10bd   : > { %4573 = vmatmul.mubr.msk.f32.vlgmr.msra.gmra.mxu1 %vm1463_vm12, %v3295_v2 }
0x10be   : > { %v4567_v3 = vpop.f32.mrf.mxu0  ;;  %4595 = vmatpush3.msra.mxu1 %v3542_v37 }
0x10bf   : > { %4596 = vmatprep.subr.mxu1 %v3541_v38  ;;  %v4227_v3 = vld [vmem:[%s5785_s11] ss:$0 sm:$0xff] }
0x10c0   : > { %4597 = vmatpush3.msra.mxu1 %v3541_v38 }
0x10c1   : > { %4598 = vmatprep.subr.mxu1 %v3540_v41 }
0x10c2   : > { %4599 = vmatpush3.msra.mxu1 %v3540_v41 }
0x10c3   : > { %4600 = vmatprep.subr.mxu1 %v3539_v11 }
0x10c4   : > { %4601 = vmatpush3.msra.mxu1 %v3539_v11 }
0x10c5   : > { %4602 = vmatprep.subr.mxu1 %v3538_v42 }
0x10c6   : > { %4603 = vmatpush3.msra.mxu1 %v3538_v42 }
0x10c7   : > { %4604 = vmatprep.subr.mxu1 %v3537_v14 }
0x10c8   : > { %4605 = vmatpush3.msra.mxu1 %v3537_v14 }
0x10c9   : > { %4606 = vmatprep.subr.mxu1 %v3536_v43 }
0x10ca   : > { %4607 = vmatpush3.msra.mxu1 %v3536_v43 }
0x10cb   : > { %4608 = vmatprep.subr.mxu1 %v3535_v44 }
0x10cc   : > { %4609 = vmatpush3.msra.mxu1 %v3535_v44 }
0x10cd   : > { %4610 = vmatprep.subr.mxu1 %v3534_v45 }
0x10ce   : > { %4611 = vmatpush3.msra.mxu1 %v3534_v45 }
0x10cf   : > { %4612 = vmatprep.subr.mxu1 %v3533_v46 }
0x10d0   : > { %4613 = vmatpush3.msra.mxu1 %v3533_v46 }
0x10d1   : > { %4614 = vmatprep.subr.mxu1 %v3532_v49 }
0x10d2   : > { %4615 = vmatpush3.msra.mxu1 %v3532_v49 }
0x10d3   : > { %4616 = vmatprep.subr.mxu1 %v3531_v50 }
0x10d4   : > { %4617 = vmatpush3.msra.mxu1 %v3531_v50 }
0x10d5   : > { %4618 = vmatprep.subr.mxu1 %v3530_v55 }
0x10d6   : > { %4619 = vmatpush3.msra.mxu1 %v3530_v55 }
0x10d7   : > { %4620 = vmatprep.subr.mxu1 %v3529_v56 }
0x10d8   : > { %4621 = vmatpush3.msra.mxu1 %v3529_v56 }
0x10d9   : > { %4622 = vmatprep.subr.mxu1 %v3528_v57 }
0x10da   : > { %4623 = vmatpush3.msra.mxu1 %v3528_v57 }
0x10db   : > { %4624 = vmatprep.subr.mxu1 %v3527_v20 }
0x10dc   : > { %4625 = vmatpush3.msra.mxu1 %v3527_v20 }
0x117d   : > { %v3368_v60 = vpop.f32.mrf.mxu1 }
0x117e   : > { %v3372_v6 = vadd.f32 %v3368_v60, %v3132_v59 }
0x117f   : > { %v4574_v8 = vpop.f32.mrf.mxu1 }
0x1180   : > { %v3381_v10 = vadd.f32 %v4221_v7, %v3372_v6 }
0x1182   : > { %v3383_v12 = vadd.f32 %v3381_v10, %v5270_v62 }
0x1184   : > { %v3389_v13 = vsel %vm1193_vm10, %v3383_v12, 0.0 }
0x1185   : > { %3390 = vadd.xlane.f32.xlu1 %v3389_v13 }
0x1189   : > { %3400 = vadd.xlane.f32.xlu1 %v3399_v18 }
0x120e   : > { %v3391_v19 = vpop.xlane.xlu1 %3390 }
0x120f   : > { %v3394_v21 = vmul.f32 0.015625, %v3391_v19 }
0x1211   : > { %v5542_v15 = vsub.f32 %v3383_v12, %v3394_v21 }
0x1212   : > { %v3401_v24 = vpop.xlane.xlu1 %3400 }
0x1213   : > { %v3405_v25 = vmul.f32 0.015625, %v3401_v24  ;;  %v3398_v62 = vmul.f32 %v5542_v15, %v5542_v15 }
0x1215   : > { %v3407_v26 = vadd.f32 1e-05, %v3405_v25  ;;  %v3402_v47 = vsel %vm1193_vm10, %v3398_v62, 0.0 }
0x1216   : > { %3403 = vadd.xlane.f32.xlu1 %v3402_v47 }
0x1217   : > { %4759 = vrsqrt.f32 %v3407_v26 }
0x1224   : > { %v4760_v48 = vpop.eup %4759 }
0x1225   : > { %v3411_v28 = vmul.f32 %v4760_v48, %v3395_v9 }
0x1227   : > { %v3419_v30 = vmul.f32 %v5552_v27, %v3411_v28 }
0x1229   : > { %v5564_v32 = vadd.f32 %v5559_v29, %v3419_v30 }
0x122b   : > { %4591 = vmatprep.mubr.msk.f32.mxu0 %vm1193_vm10, %v5564_v32 }
0x129f   : > { %v3404_v39 = vpop.xlane.xlu1 %3403 }
0x12a0   : > { %v3406_v51 = vmul.f32 0.015625, %v3404_v39 }
0x12a2   : > { %v3408_v52 = vadd.f32 1e-05, %v3406_v51 }
0x12a4   : > { %4761 = vrsqrt.f32 %v3408_v52 }
0x12b1   : > { %v4762_v40 = vpop.eup %4761 }
0x12b2   : > { %v3412_v54 = vmul.f32 %v4762_v40, %v5542_v15 }
0x12b4   : > { %v3420_v7 = vmul.f32 %v5552_v27, %v3412_v54 }
0x12b6   : > { %v3428_v53 = vadd.f32 %v5559_v29, %v3420_v7 }
0x12b8   : > { %4592 = vmatmul.mubr.msk.f32.vlgmr.msra.gmra.mxu0 %vm1193_vm10, %v3428_v53 }
0x1378   : > { %v4593_v59 = vpop.f32.mrf.mxu0 }
0x1379   : > { %v3522_v61 = vadd.f32 %v4593_v59, %v4224_v58 }
0x137a   : > { %v3516_v63 = vpop.f32.mrf.mxu0 }
0x137b   : > { %v3517_v0 = vadd.f32 %v4224_v58, %v3516_v63  ;;  %v3526_v2 = vmax.f32 %v3522_v61, 0.0 }
0x137d   : > { %v3525_v1 = vmax.f32 %v3517_v0, 0.0 }
0x137f   : > { %4626 = vmatprep.mubr.f32.mxu1 %v3525_v1 }
0x1380   : > { %4627 = vmatmul.mubr.f32.vlgmr.msra.gmra.mxu1 %v3526_v2 }
0x1440   : > { %v4628_v4 = vpop.f32.mrf.mxu1 }
0x1441   : > { %v3622_v5 = vadd.f32 %v4628_v4, %v4227_v3 }
0x1442   : > { %v3616_v60 = vpop.f32.mrf.mxu1 }
0x1443   : > { %v3617_v6 = vadd.f32 %v4227_v3, %v3616_v60  ;;  %v3626_v8 = vadd.f32 %v3622_v5, %v3428_v53 }
0x1445   : > { %v3632_v9 = vsel %vm1193_vm10, %v3626_v8, 0.0  ;;  %v3625_v10 = vadd.f32 %v3617_v6, %v5564_v32  ;;  %v4228_v32 = vld [vmem:[%s953_s12] ss:$0 sm:$0xff] }
0x1446   : > { %3633 = vadd.xlane.f32.xlu1 %v3632_v9 }
0x1447   : > { %v3629_v12 = vsel %vm1193_vm10, %v3625_v10, 0.0 }
0x1448   : > { %3630 = vadd.xlane.f32.xlu0 %v3629_v12 }
0x14cf   : > { %v3634_v13 = vpop.xlane.xlu1 %3633 }
0x14d0   : > { %v3636_v17 = vmul.f32 0.015625, %v3634_v13 }
0x14d1   : > { %v3631_v18 = vpop.xlane.xlu0 %3630 }
0x14d2   : > { %v3635_v19 = vmul.f32 0.015625, %v3631_v18  ;;  %v3638_v21 = vsub.f32 %v3626_v8, %v3636_v17 }
0x14d4   : > { %v3637_v15 = vsub.f32 %v3625_v10, %v3635_v19  ;;  %v3640_v62 = vmul.f32 %v3638_v21, %v3638_v21 }
0x14d6   : > { %v3639_v24 = vmul.f32 %v3637_v15, %v3637_v15  ;;  %v3644_v26 = vsel %vm1193_vm10, %v3640_v62, 0.0 }
0x14d8   : > { %v3641_v25 = vsel %vm1193_vm10, %v3639_v24, 0.0 }
0x14d9   : > { %3642 = vadd.xlane.f32.xlu1 %v3641_v25 }
0x14dd   : > { %3645 = vadd.xlane.f32.xlu1 %v3644_v26 }
0x1562   : > { %v3643_v47 = vpop.xlane.xlu1 %3642 }
0x1563   : > { %v3647_v48 = vmul.f32 0.015625, %v3643_v47 }
0x1565   : > { %v3649_v27 = vadd.f32 1e-05, %v3647_v48 }
0x1566   : > { %v3646_v28 = vpop.xlane.xlu1 %3645 }
0x1567   : > { %4763 = vrsqrt.f32 %v3649_v27  ;;  %v3648_v29 = vmul.f32 0.015625, %v3646_v28 }
0x1569   : > { %v3650_v30 = vadd.f32 1e-05, %v3648_v29 }
0x156b   : > { %4765 = vrsqrt.f32 %v3650_v30 }
0x1574   : > { %v4764_v31 = vpop.eup %4763 }
0x1575   : > { %v3653_v33 = vmul.f32 %v4764_v31, %v3637_v15 }
0x1577   : > { %v3661_v35 = vmul.f32 %v4228_v32, %v3653_v33 }
0x1578   : > { %v4766_v16 = vpop.eup %4765 }
0x1579   : > { %v3669_v23 = vadd.f32 %v4229_v34, %v3661_v35  ;;  %v3654_v22 = vmul.f32 %v4766_v16, %v3638_v21 }
0x157b   : > { %3671 = vst.msk [vmem:[#allocation2] sm:$0xff] %vm1193_vm10, %v3669_v23  ;;  %v3662_v36 = vmul.f32 %v4228_v32, %v3654_v22  ;;  %3676 = sbr.rel (%p4230_p10) target bundleno = 5730 (0x1662), region = 120 }
0x157d   : > { %v3670_v37 = vadd.f32 %v4229_v34, %v3662_v36 }
0x157f   : > { %3672 = vst.msk [vmem:[#allocation2 + $0x8] sm:$0xff] %vm1193_vm10, %v3670_v37 }
0x1580   : > { %v3684_v38 = vld [vmem:[%s5788_s20 + $0x38] sm:$0xff]  ;;  %v3683_v41 = vld [vmem:[%s5788_s20 + $0x30] sm:$0xff]  ;;  %4645 = vmatprep.mubr.msk.f32.mxu0 %vm1193_vm10, %v3669_v23  ;;  %v3682_v11 = vld [vmem:[%s5788_s20 + $0x28] sm:$0xff]  ;;  %v4918_v46 = vmov 1966171168   ;;  %v3778_v50 = vlaneseq  ;;  %vm3831_vm14 = vcmask 57344  }
0x1581   : > { %4629 = vmatprep.subr.mxu0 %v3684_v38  ;;  %v3681_v42 = vld [vmem:[%s5788_s20 + $0x20] sm:$0xff]  ;;  %v3680_v14 = vld [vmem:[%s5788_s20 + $0x18] sm:$0xff]  ;;  %v3679_v43 = vld [vmem:[%s5788_s20 + $0x10] sm:$0xff]  ;;  %v3776_v49 = vunpack.c.l.s4 %v4918_v46 }
0x1582   : > { %4630 = vmatpush3.msra.mxu0 %v3684_v38  ;;  %v3678_v44 = vld [vmem:[%s5788_s20 + $0x8] sm:$0xff]  ;;  %v3677_v45 = vld [vmem:[%s5788_s20] sm:$0xff]  ;;  %v3779_v51 = vshrl.u32 %v3778_v50, 7 }
0x1583   : > { %4631 = vmatprep.subr.mxu0 %v3683_v41  ;;  %v3777_v39 = vunpack.c.0.s8 %v3776_v49  ;;  %v4231_v52 = vld [vmem:[%s5789_s29] ss:$0 sm:$0xff] }
0x1584   : > { %4632 = vmatpush3.msra.mxu0 %v3683_v41 }
0x1585   : > { %4633 = vmatprep.subr.mxu0 %v3682_v11  ;;  %v3780_v40 = vsub.s32 %v3777_v39, %v3779_v51 }
0x1586   : > { %4634 = vmatpush3.msra.mxu0 %v3682_v11 }
0x1587   : > { %4635 = vmatprep.subr.mxu0 %v3681_v42 }
0x1588   : > { %4636 = vmatpush3.msra.mxu0 %v3681_v42 }
0x1589   : > { %4637 = vmatprep.subr.mxu0 %v3680_v14 }
0x158a   : > { %4638 = vmatpush3.msra.mxu0 %v3680_v14 }
0x158b   : > { %4639 = vmatprep.subr.mxu0 %v3679_v43 }
0x158c   : > { %4640 = vmatpush3.msra.mxu0 %v3679_v43 }
0x158d   : > { %4641 = vmatprep.subr.mxu0 %v3678_v44 }
0x158e   : > { %4642 = vmatpush3.msra.mxu0 %v3678_v44 }
0x158f   : > { %4643 = vmatprep.subr.mxu0 %v3677_v45 }
0x1590   : > { %4644 = vmatpush3.msra.mxu0 %v3677_v45 }
0x1591   : > { %4646 = vmatmul.mubr.msk.f32.vlgmr.msra.gmra.mxu0 %vm1193_vm10, %v3670_v37 }
0x1651   : > { %v4647_v54 = vpop.f32.mrf.mxu0 }
0x1652   : > { %v3770_v7 = vadd.f32 %v4647_v54, %v4231_v52 }
0x1653   : > { %v3764_v53 = vpop.f32.mrf.mxu0 }
0x1654   : > { %v3841_v55 = vcombine.high %v3770_v7, %v3770_v7  ;;  %v3848_v56 = vrot.slane %v3770_v7, %v3780_v40  ;;  %v3765_v57 = vadd.f32 %v4231_v52, %v3764_v53 }
0x1656   : > { %v3855_v20 = vrot.slane %v3841_v55, %v3780_v40  ;;  %v3856_v58 = vcombine.high %v3848_v56, %v3848_v56  ;;  %v3864_v59 = vrot.slane %v3848_v56, %v3780_v40  ;;  %v3774_v61 = vcombine.high %v3765_v57, %v3765_v57 }
0x1657   : > { %v3781_v63 = vrot.slane %v3765_v57, %v3780_v40 }
0x1658   : > { %v3857_v0 = vcombine.high %v3855_v20, %v3855_v20  ;;  %v3871_v1 = vrot.slane %v3855_v20, %v3780_v40  ;;  %v3878_v2 = vrot.slane %v3856_v58, %v3780_v40  ;;  %v3886_v3 = vcombine.high %v3864_v59, %v3864_v59  ;;  %3898 = vst.msk [vmem:[#allocation8 + $0x1] sm:$0x1] %vm3831_vm14, %v3864_v59 }
0x1659   : > { %v3788_v4 = vrot.slane %v3774_v61, %v3780_v40  ;;  %v3789_v5 = vcombine.high %v3781_v63, %v3781_v63  ;;  %v3797_v60 = vrot.slane %v3781_v63, %v3780_v40 }
0x165a   : > { %v3885_v6 = vrot.slane %v3857_v0, %v3780_v40  ;;  %v3887_v8 = vcombine.high %v3871_v1, %v3871_v1  ;;  %v3888_v9 = vcombine.high %v3878_v2, %v3878_v2  ;;  %3899 = vst.msk [vmem:[#allocation8 + $0x3] sm:$0x1] %vm3831_vm14, %v3878_v2  ;;  %3900 = vst.msk [vmem:[#allocation8 + $0x5] sm:$0x1] %vm3831_vm14, %v3886_v3 }
0x165b   : > { %3902 = vst.msk [vmem:[#allocation8 + $0x9] sm:$0x1] %vm3831_vm14, %v3871_v1  ;;  %v3790_v10 = vcombine.high %v3788_v4, %v3788_v4  ;;  %v3804_v12 = vrot.slane %v3788_v4, %v3780_v40  ;;  %v3811_v13 = vrot.slane %v3789_v5, %v3780_v40  ;;  %v3819_v17 = vcombine.high %v3797_v60, %v3797_v60 }
0x165c   : > { %3832 = vst.msk [vmem:[#allocation8] sm:$0x1] %vm3831_vm14, %v3797_v60  ;;  %v3889_v18 = vcombine.high %v3885_v6, %v3885_v6  ;;  %3901 = vst.msk [vmem:[#allocation8 + $0x7] sm:$0x1] %vm3831_vm14, %v3888_v9 }
0x165d   : > { %3903 = vst.msk [vmem:[#allocation8 + $0xb] sm:$0x1] %vm3831_vm14, %v3885_v6  ;;  %3904 = vst.msk [vmem:[#allocation8 + $0xd] sm:$0x1] %vm3831_vm14, %v3887_v8  ;;  %v3818_v19 = vrot.slane %v3790_v10, %v3780_v40  ;;  %v3820_v21 = vcombine.high %v3804_v12, %v3804_v12  ;;  %v3821_v15 = vcombine.high %v3811_v13, %v3811_v13 }
0x165e   : > { %3833 = vst.msk [vmem:[#allocation8 + $0x2] sm:$0x1] %vm3831_vm14, %v3811_v13  ;;  %3834 = vst.msk [vmem:[#allocation8 + $0x4] sm:$0x1] %vm3831_vm14, %v3819_v17 }
0x165f   : > { %3836 = vst.msk [vmem:[#allocation8 + $0x8] sm:$0x1] %vm3831_vm14, %v3804_v12  ;;  %3905 = vst.msk [vmem:[#allocation8 + $0xf] sm:$0x1] %vm3831_vm14, %v3889_v18  ;;  %v3822_v24 = vcombine.high %v3818_v19, %v3818_v19 }
0x1660   : > { %3835 = vst.msk [vmem:[#allocation8 + $0x6] sm:$0x1] %vm3831_vm14, %v3821_v15  ;;  %3837 = vst.msk [vmem:[#allocation8 + $0xa] sm:$0x1] %vm3831_vm14, %v3818_v19 }
0x1661   : > { %3838 = vst.msk [vmem:[#allocation8 + $0xc] sm:$0x1] %vm3831_vm14, %v3820_v21  ;;  %3839 = vst.msk [vmem:[#allocation8 + $0xe] sm:$0x1] %vm3831_vm14, %v3822_v24 }
0x1662 PF: > { %s5790_s18 = sld [smem:[#allocation15_spill]]  ;;  %s4919_s30 = smov [#allocation8]  }
0x1663   : > { %s3914_s12 = sshll.u32 %s4919_s30, 4  ;;  %s3915_s12 = int_to_ptr.vmem [resolvable:$true] %s3914_s12 }
0x1664   : > { %s4823_s2 = scalar_lea.vmem %s3915_s12, 256  ;;  %p4830_p8 = scmp.lt.s32.totalorder %s3915_s12, %s3915_s12 }
0x1665   : > { %p4824_p4 = scmp.ne.s32.totalorder %s3915_s12, %s4823_s2  ;;  %p4831_p11 = scmp.lt.s32.totalorder %s4823_s2, %s4823_s2 }
0x1667   : > { %p4832_p12 = por %p4831_p11, %p4830_p8 }
0x1668   : > { %s5791_s21 = sadd.s32 4294967295, %s5790_s18  }
0x1669   : > { %p5670_p3 = scmp.eq.s32.totalorder %s5791_s21, 1 }
0x166b   : > { %p4825_p5 = pnand %p4824_p4, %p5670_p3 }
0x166d   : > { %p4826_p6 = pneg %p4825_p5 }
0x166f   : > { %p4833_p13 = pnand %p4832_p12, %p4826_p6 }
0x1671   : > { %4836 = shalt.err (!%p4833_p13)
}
0x1672   : > { %s4920_s0 = smov 32   ;;  %s4921_s9 = smov 2  }
0x1673   : > { %s5793_s27 = sld [smem:[#allocation34_spill]] }
0x1679   : > { %4653 = dma.vmem_to_hbm [thread:$0]  (%p5670_p3), %s3915_s12, 256, %s5793_s27, [#allocation5], %s4920_s0, %s4920_s0, %s4921_s9  }
0x167a   : > { %4880 = dma.done.wait (%p5670_p3), [#allocation5], 256  }
0x167b   : > { %4882 = vsyncadd (%p5670_p3), [#allocation5], 4294967040 }
0x167c PF: > { %s5794_s28 = sld [smem:[#allocation15_spill]] }
0x167d   : > { %s5795_s2 = sld [smem:[#allocation12_spill]] }
0x167e   : > { %s5796_s25 = sld [smem:[#allocation13_spill]] }
0x167f   : > { %s5797_s26 = sld [smem:[#allocation17_spill]] }
0x1680   : > { %s5798_s27 = sld [smem:[#allocation14_spill]] }
0x1681   : > { %s5799_s3 = sld [smem:[#allocation16_spill]] }
0x1682   : > { %s38_s28 = sadd.s32 1, %s5794_s28  }
0x1683   : > { %p35_p0 = scmp.ge.s32.totalorder %s38_s28, 4  }
0x1685   :  { %37 = sbr.rel (!%p35_p0) target bundleno = 24 (0x18), region = 208 }
0x168a   :  { %3930 = vsyncpa [#allocation4], 1 }
0x168b   :  { %3932 = vsyncpa [#allocation4 + $0x1], 1 }
0x168c   :  { %3933 = vsyncpa [#allocation7], 1 }
0x168d   :  { %3935 = vsyncpa [#allocation7 + $0x1], 1 }
0x168e   :  { %3936 = vsyncpa [#allocation5], 1 }
0x168f   :  { %3938 = vsyncpa [#allocation5 + $0x1], 1 }

</bundles_post_ra>
